<compile_context>
chip_gen: v5e
topology: v5e:2x2
jax: 0.10.0
libtpu: 0.0.40
codegen_flags: <defaults>
</compile_context>

<pallas_src>
import functools

import jax
import jax.numpy as jnp
from jax.experimental import pallas as pl
from jax.experimental.pallas import tpu as pltpu


# ---------------------------------------------------------------------------
# Pallas kernels
# ---------------------------------------------------------------------------

def _matmul_bias_kernel(x_ref, w_ref, b_ref, o_ref, *, relu):
    y = jnp.dot(x_ref[...], w_ref[...], preferred_element_type=jnp.float32)
    y = y + b_ref[...]                        # (1, N) broadcasts over rows
    if relu:
        y = jnp.maximum(y, 0.0)
    o_ref[...] = y.astype(o_ref.dtype)


def _matmul_relu_pool4_kernel(x_ref, w_ref, b_ref, o_ref):
    # x_ref block is (4, bm, K): 4 pooling quadrants, identical (n, ph, pw) row
    # order in each.  MaxPool2d(2,2) == elementwise max over the quadrant axis
    # (ReLU and max commute, so relu(max(.)) == max(relu(.))).
    w = w_ref[...]
    b = b_ref[...]
    y = None
    for q in range(4):
        z = jnp.dot(x_ref[q], w, preferred_element_type=jnp.float32) + b
        y = z if y is None else jnp.maximum(y, z)
    o_ref[...] = jnp.maximum(y, 0.0).astype(o_ref.dtype)


def _head_kernel(f3_ref, d_ref, w3_ref, b3_ref, wfc_ref, bfc_ref,
                 w1i_ref, w1d_ref, b1_ref, w2_ref, b2_ref, o_ref):
    f32 = jnp.float32
    # conv3 (1x1 spatial output) fused in as a plain linear on the 3x3 pooled
    # window patch matrix, + ReLU.  This is exactly PyTorch's conv3+ReLU+Flatten.
    c3 = jnp.maximum(
        jnp.dot(f3_ref[...], w3_ref[...], preferred_element_type=f32) + b3_ref[...],
        0.0)                                                            # (B, 32)
    # fc1 branch: ReLU(data @ Wfc + bfc)
    d = jnp.maximum(
        jnp.dot(d_ref[...], wfc_ref[...], preferred_element_type=f32) + bfc_ref[...],
        0.0)                                                            # (B, 12)
    # val1 & adv1 fused into one 256-wide matmul over a = [conv_feat | fc_feat],
    # expressed as a split contraction (no in-kernel concat).
    va = jnp.maximum(
        jnp.dot(c3, w1i_ref[...], preferred_element_type=f32)
        + jnp.dot(d, w1d_ref[...], preferred_element_type=f32)
        + b1_ref[...], 0.0)                                             # (B, 256)
    # val2/adv2 merged into ONE block-diagonal (256, 1+A) weight.
    out2 = jnp.dot(va, w2_ref[...], preferred_element_type=f32) + b2_ref[...]
    values = out2[:, :1]                                                # (B, 1)
    adv = out2[:, 1:]                                                   # (B, A)
    # Dueling combine; PyTorch uses advantages.mean() => GLOBAL mean (batch+actions).
    mean = jnp.sum(adv) * (1.0 / float(adv.shape[0] * adv.shape[1]))
    o_ref[...] = (values + adv - mean).astype(o_ref.dtype)


# ---------------------------------------------------------------------------
# Kernel wrappers
# ---------------------------------------------------------------------------

def matmul_bias_act(x, w, b2d, *, relu=False, block_m=1024):
    """x:(M,K) @ w:(K,N) + b2d:(1,N) [+ ReLU], row-tiled with a parallel grid.

    M is padded up to a multiple of the block (padded rows sliced off) instead
    of silently falling back to a single full-M block.
    """
    M, K = x.shape
    N = w.shape[1]
    bm = M if M <= block_m else block_m
    Mp = pl.cdiv(M, bm) * bm
    if Mp != M:
        x = jnp.pad(x, ((0, Mp - M), (0, 0)))
    out = pl.pallas_call(
        functools.partial(_matmul_bias_kernel, relu=relu),
        out_shape=jax.ShapeDtypeStruct((Mp, N), jnp.float32),
        grid=(Mp // bm,),
        in_specs=[
            pl.BlockSpec((bm, K), lambda i: (i, 0)),
            pl.BlockSpec((K, N), lambda i: (0, 0)),
            pl.BlockSpec((1, N), lambda i: (0, 0)),
        ],
        out_specs=pl.BlockSpec((bm, N), lambda i: (i, 0)),
        compiler_params=pltpu.CompilerParams(
            dimension_semantics=("parallel",)),
    )(x, w, b2d)
    return out[:M] if Mp != M else out


def _im2col_nhwc(xp, kh, kw, stride, ho, wo, row_off=0, col_off=0):
    """Patches of a padded NHWC tensor -> (N, ho, wo, kh*kw*C); columns in (ki,kj,c) order."""
    cols = []
    for ki in range(kh):
        for kj in range(kw):
            r0, c0 = row_off + ki, col_off + kj
            cols.append(xp[:, r0:r0 + stride * (ho - 1) + 1:stride,
                              c0:c0 + stride * (wo - 1) + 1:stride, :])
    return jnp.concatenate(cols, axis=-1)


def conv2d_cl(x, w_packed, b2d, *, k, stride, pad, relu=True, block_m=1024):
    """Channels-last conv: x (N,H,W,C), w_packed (k*k*C,O), b2d (1,O) -> (N,Ho,Wo,O)."""
    N, H, W, C = x.shape
    O = w_packed.shape[1]
    ho = (H + 2 * pad - k) // stride + 1
    wo = (W + 2 * pad - k) // stride + 1
    xp = x if pad == 0 else jnp.pad(x, ((0, 0), (pad, pad), (pad, pad), (0, 0)))
    p = _im2col_nhwc(xp, k, k, stride, ho, wo).reshape(N * ho * wo, k * k * C)
    y = matmul_bias_act(p, w_packed, b2d, relu=relu, block_m=block_m)
    return y.reshape(N, ho, wo, O)


def conv2d_relu_maxpool2_cl(x, w_packed, b2d, *, k, stride, pad, block_m=256):
    """Channels-last conv + ReLU + MaxPool2d(2,2), fused and ROW-TILED."""
    N, H, W, C = x.shape
    O = w_packed.shape[1]
    ho = (H + 2 * pad - k) // stride + 1
    wo = (W + 2 * pad - k) // stride + 1
    hp, wp = ho // 2, wo // 2                  # MaxPool2d floors, same as PyTorch
    xp = x if pad == 0 else jnp.pad(x, ((0, 0), (pad, pad), (pad, pad), (0, 0)))
    K = k * k * C
    M = N * hp * wp
    # Quadrant-major patches: (4, M, K); each quadrant has row order (n, ph, pw).
    quads = []
    for di in range(2):
        for dj in range(2):
            q = _im2col_nhwc(xp, k, k, 2 * stride, hp, wp,
                             row_off=stride * di, col_off=stride * dj)
            quads.append(q.reshape(M, K))
    patches = jnp.stack(quads, axis=0)         # (4, M, K)

    bm = M if M <= block_m else block_m
    Mp = pl.cdiv(M, bm) * bm
    if Mp != M:
        patches = jnp.pad(patches, ((0, 0), (0, Mp - M), (0, 0)))
    out = pl.pallas_call(
        _matmul_relu_pool4_kernel,
        out_shape=jax.ShapeDtypeStruct((Mp, O), jnp.float32),
        grid=(Mp // bm,),
        in_specs=[
            pl.BlockSpec((4, bm, K), lambda i: (0, i, 0)),
            pl.BlockSpec((K, O), lambda i: (0, 0)),
            pl.BlockSpec((1, O), lambda i: (0, 0)),
        ],
        out_specs=pl.BlockSpec((bm, O), lambda i: (i, 0)),
        compiler_params=pltpu.CompilerParams(
            dimension_semantics=("parallel",)),
    )(patches, w_packed, b2d)
    if Mp != M:
        out = out[:M]
    return out.reshape(N, hp, wp, O)


def _full_spec(arr):
    zeros = (0,) * arr.ndim
    return pl.BlockSpec(arr.shape, lambda i: zeros)


def head_pallas(feat3, data, params):
    """Fused conv3(1x1) + fc1 + value/advantage streams + dueling combine.

    Single pallas_call; all intermediates stay in VMEM/vregs.  grid=(1,) because
    the GLOBAL advantage mean couples the whole batch (faithful to PyTorch);
    sharding it would need a grid-serial accumulator.
    """
    B = feat3.shape[0]
    A = params["w2m"].shape[1] - 1
    args = (feat3, data,
            params["conv3_w"], params["conv3_b"],
            params["wfc"], params["bfc"],
            params["w1i"], params["w1d"], params["b1"],
            params["w2m"], params["b2m"])
    return pl.pallas_call(
        _head_kernel,
        out_shape=jax.ShapeDtypeStruct((B, A), jnp.float32),
        grid=(1,),
        in_specs=[_full_spec(a) for a in args],
        out_specs=pl.BlockSpec((B, A), lambda i: (0, 0)),
        compiler_params=pltpu.CompilerParams(
            dimension_semantics=("arbitrary",)),
    )(*args)


# ---------------------------------------------------------------------------
# Parameter init (PyTorch default uniform fan-in) + one-time packing
# ---------------------------------------------------------------------------

def _uniform(key, shape, bound):
    return jax.random.uniform(key, shape, jnp.float32, -bound, bound)


def _init_linear(key, in_f, out_f):
    k1, k2 = jax.random.split(key)
    bound = 1.0 / (in_f ** 0.5)
    return _uniform(k1, (out_f, in_f), bound), _uniform(k2, (out_f,), bound)


def _init_conv(key, in_c, out_c, k):
    k1, k2 = jax.random.split(key)
    bound = 1.0 / ((in_c * k * k) ** 0.5)
    return _uniform(k1, (out_c, in_c, k, k), bound), _uniform(k2, (out_c,), bound)


def _pack_conv(w, b):
    """PyTorch (O,C,kh,kw) conv weight -> im2col (kh*kw*C, O) matrix, bias -> (1,O)."""
    O, C, kh, kw = w.shape
    return w.transpose(2, 3, 1, 0).reshape(kh * kw * C, O), b.reshape(1, O)


def init_params(key, image_shape, data_shape, n_actions):
    """image_shape / data_shape are the probe shapes the PyTorch module is built with."""
    ks = jax.random.split(key, 8)
    c_in, H, W = image_shape[1], image_shape[2], image_shape[3]

    conv1 = _init_conv(ks[0], c_in, 32, 4)
    conv2 = _init_conv(ks[1], 32, 32, 4)
    conv3 = _init_conv(ks[2], 32, 32, 3)
    fc1 = _init_linear(ks[3], data_shape[1], 12)

    # Probe shapes (PyTorch probes with batch 1 -> identical per-sample values).
    h1, w1_ = (H + 2 - 4) // 2 + 1, (W + 2 - 4) // 2 + 1
    h2, w2_ = (h1 + 2 - 4) // 2 + 1, (w1_ + 2 - 4) // 2 + 1
    h3, w3_ = h2 // 2, w2_ // 2
    h4, w4_ = (h3 - 3) // 2 + 1, (w3_ - 3) // 2 + 1
    # The fused head assumes conv3's output is 1x1 (true for the 32x32 spec).
    # TODO(synk): general non-1x1 conv3 output would need a standalone conv3 call.
    assert h4 == 1 and w4_ == 1 and h3 >= 3 and w3_ >= 3, (h3, w3_, h4, w4_)
    conv_feat = 32 * h4 * w4_
    feat = conv_feat + 12

    val1 = _init_linear(ks[4], feat, 128)
    val2 = _init_linear(ks[5], 128, 1)
    adv1 = _init_linear(ks[6], feat, 128)
    adv2 = _init_linear(ks[7], 128, n_actions)

    # Pack once into kernel-friendly layouts: weights (in,out), biases (1,out).
    cw1, cb1 = _pack_conv(*conv1)
    cw2, cb2 = _pack_conv(*conv2)
    cw3, cb3 = _pack_conv(*conv3)
    # val1/adv1 stacked into one 256-wide matrix, split by input part (conv | fc).
    w1 = jnp.concatenate([val1[0].T, adv1[0].T], axis=1)          # (feat, 256)
    # val2/adv2 merged into one block-diagonal (256, 1+A) weight.
    w2m = jnp.zeros((256, 1 + n_actions), jnp.float32)
    w2m = w2m.at[:128, :1].set(val2[0].T)
    w2m = w2m.at[128:, 1:].set(adv2[0].T)
    b2m = jnp.concatenate([val2[1], adv2[1]]).reshape(1, 1 + n_actions)

    return {
        "conv1_w": cw1, "conv1_b": cb1,
        "conv2_w": cw2, "conv2_b": cb2,
        "conv3_w": cw3, "conv3_b": cb3,
        "wfc": fc1[0].T, "bfc": fc1[1].reshape(1, -1),
        "w1i": w1[:conv_feat], "w1d": w1[conv_feat:],
        "b1": jnp.concatenate([val1[1], adv1[1]]).reshape(1, -1),
        "w2m": w2m, "b2m": b2m,
    }


# ---------------------------------------------------------------------------
# Forward pass
# ---------------------------------------------------------------------------

def forward(params, image, data):
    # One NCHW -> NHWC transpose at entry; everything else stays channels-last.
    x = jnp.transpose(image, (0, 2, 3, 1))
    # conv1 + ReLU (row-tiled Pallas matmul, parallel grid).
    x = conv2d_cl(x, params["conv1_w"], params["conv1_b"],
                  k=4, stride=2, pad=1, block_m=1024)
    # conv2 + ReLU + MaxPool2d(2,2) fused in one row-tiled Pallas kernel.
    x = conv2d_relu_maxpool2_cl(x, params["conv2_w"], params["conv2_b"],
                                k=4, stride=2, pad=1, block_m=256)
    # conv3 has a 1x1 output here: build its (B, 3*3*32) patch matrix from the
    # pooled activation and let the fused head kernel do conv3 + fc1 + streams.
    N = x.shape[0]
    feat3 = x[:, :3, :3, :].reshape(N, 3 * 3 * x.shape[-1])
    return head_pallas(feat3, data, params)


# ---------------------------------------------------------------------------

if __name__ == "__main__":
    key = jax.random.PRNGKey(0)
    k_p, k_img, k_dat = jax.random.split(key, 3)

    # Module constructed with image_shape=(1, 4, 32, 32), data_shape=(1, 8); forward B=2.
    image_shape = (1, 4, 32, 32)
    data_shape = (1, 8)
    n_actions = 6
    B = 2

    params = init_params(k_p, image_shape, data_shape, n_actions)

    image = jax.random.normal(k_img, (B,) + image_shape[1:], jnp.float32)
    data = jax.random.normal(k_dat, (B, data_shape[1]), jnp.float32)

    fwd = jax.jit(forward)
    q = fwd(params, image, data)
    q = jax.block_until_ready(q)
    assert q.shape == (B, n_actions), q.shape
    assert q.dtype == jnp.float32
    print("KERNEL_OK")
</pallas_src>

<mosaic_0001>
module attributes {stable_mosaic.version = 11 : i64} {
  func.func @_matmul_bias_kernel(%arg0: i32, %arg1: memref<512x64xf32, #tpu.memory_space<vmem>>, %arg2: memref<64x32xf32, #tpu.memory_space<vmem>>, %arg3: memref<1x32xf32, #tpu.memory_space<vmem>>, %arg4: memref<512x32xf32, #tpu.memory_space<vmem>>) attributes {dimension_semantics = [#tpu.dimension_semantics<parallel>], iteration_bounds = array<i64: 1>, scalar_prefetch = 0 : i64, scratch_operands = 0 : i64, tpu.core_type = #tpu.core_type<tc>, window_params = [{transform_indices = @transform_0, window_bounds = array<i64: 512, 64>}, {pipeline_mode = #tpu.pipeline_mode<synchronous>, transform_indices = @transform_1, window_bounds = array<i64: 64, 32>}, {pipeline_mode = #tpu.pipeline_mode<synchronous>, transform_indices = @transform_2, window_bounds = array<i64: 1, 32>}, {transform_indices = @transform_3, window_bounds = array<i64: 512, 32>}]} {
    %c0 = arith.constant 0 : index
    %c0_0 = arith.constant 0 : index
    %0 = vector.load %arg1[%c0, %c0_0] : memref<512x64xf32, #tpu.memory_space<vmem>>, vector<512x64xf32>
    %c0_1 = arith.constant 0 : index
    %c0_2 = arith.constant 0 : index
    %1 = vector.load %arg2[%c0_1, %c0_2] : memref<64x32xf32, #tpu.memory_space<vmem>>, vector<64x32xf32>
    %cst = arith.constant dense<0.000000e+00> : vector<512x32xf32>
    %2 = tpu.matmul %0, %1, %cst {dimension_numbers = #tpu.dot_dimension_numbers<[1], [0], [0], [1], [0, 0, 1, 1], [], []>} : vector<512x64xf32>, vector<64x32xf32>, vector<512x32xf32> -> vector<512x32xf32>
    %c0_3 = arith.constant 0 : index
    %c0_4 = arith.constant 0 : index
    %3 = vector.load %arg3[%c0_3, %c0_4] : memref<1x32xf32, #tpu.memory_space<vmem>>, vector<1x32xf32>
    %4 = vector.broadcast %3 : vector<1x32xf32> to vector<512x32xf32>
    %5 = arith.addf %2, %4 : vector<512x32xf32>
    %cst_5 = arith.constant 0.000000e+00 : f32
    %6 = vector.broadcast %cst_5 : f32 to vector<512x32xf32>
    %7 = arith.maximumf %5, %6 : vector<512x32xf32>
    %c0_6 = arith.constant 0 : index
    %c0_7 = arith.constant 0 : index
    %8 = vector.load %arg4[%c0_6, %c0_7] : memref<512x32xf32, #tpu.memory_space<vmem>>, vector<512x32xf32>
    tpu.vector_store %arg4[%c0_6, %c0_7], %7 {strides = array<i32>} : memref<512x32xf32, #tpu.memory_space<vmem>>, vector<512x32xf32>,
    return
  }
  func.func @transform_0(%arg0: i32) -> (i32, i32) {
    %c0_i32 = arith.constant 0 : i32
    %c0_i32_0 = arith.constant 0 : i32
    return %arg0, %c0_i32 : i32, i32
  }
  func.func @transform_1(%arg0: i32) -> (i32, i32) {
    %c0_i32 = arith.constant 0 : i32
    %c0_i32_0 = arith.constant 0 : i32
    %c0_i32_1 = arith.constant 0 : i32
    return %c0_i32, %c0_i32_0 : i32, i32
  }
  func.func @transform_2(%arg0: i32) -> (i32, i32) {
    %c0_i32 = arith.constant 0 : i32
    %c0_i32_0 = arith.constant 0 : i32
    %c0_i32_1 = arith.constant 0 : i32
    return %c0_i32, %c0_i32_0 : i32, i32
  }
  func.func @transform_3(%arg0: i32) -> (i32, i32) {
    %c0_i32 = arith.constant 0 : i32
    %c0_i32_0 = arith.constant 0 : i32
    return %arg0, %c0_i32 : i32, i32
  }
}

module attributes {stable_mosaic.version = 11 : i64} {
  func.func @_matmul_relu_pool4_kernel(%arg0: i32, %arg1: memref<4x32x512xf32, #tpu.memory_space<vmem>>, %arg2: memref<512x32xf32, #tpu.memory_space<vmem>>, %arg3: memref<1x32xf32, #tpu.memory_space<vmem>>, %arg4: memref<32x32xf32, #tpu.memory_space<vmem>>) attributes {dimension_semantics = [#tpu.dimension_semantics<parallel>], iteration_bounds = array<i64: 1>, scalar_prefetch = 0 : i64, scratch_operands = 0 : i64, tpu.core_type = #tpu.core_type<tc>, window_params = [{transform_indices = @transform_0, window_bounds = array<i64: 4, 32, 512>}, {pipeline_mode = #tpu.pipeline_mode<synchronous>, transform_indices = @transform_1, window_bounds = array<i64: 512, 32>}, {pipeline_mode = #tpu.pipeline_mode<synchronous>, transform_indices = @transform_2, window_bounds = array<i64: 1, 32>}, {transform_indices = @transform_3, window_bounds = array<i64: 32, 32>}]} {
    %c0 = arith.constant 0 : index
    %c0_0 = arith.constant 0 : index
    %0 = vector.load %arg2[%c0, %c0_0] : memref<512x32xf32, #tpu.memory_space<vmem>>, vector<512x32xf32>
    %c0_1 = arith.constant 0 : index
    %c0_2 = arith.constant 0 : index
    %1 = vector.load %arg3[%c0_1, %c0_2] : memref<1x32xf32, #tpu.memory_space<vmem>>, vector<1x32xf32>
    %c0_3 = arith.constant 0 : index
    %c0_4 = arith.constant 0 : index
    %c0_5 = arith.constant 0 : index
    %2 = vector.load %arg1[%c0_3, %c0_4, %c0_5] : memref<4x32x512xf32, #tpu.memory_space<vmem>>, vector<1x32x512xf32>
    %3 = vector.shape_cast %2 : vector<1x32x512xf32> to vector<32x512xf32>
    %cst = arith.constant dense<0.000000e+00> : vector<32x32xf32>
    %4 = tpu.matmul %3, %0, %cst {dimension_numbers = #tpu.dot_dimension_numbers<[1], [0], [0], [1], [0, 0, 1, 1], [], []>} : vector<32x512xf32>, vector<512x32xf32>, vector<32x32xf32> -> vector<32x32xf32>
    %5 = vector.broadcast %1 : vector<1x32xf32> to vector<32x32xf32>
    %6 = arith.addf %4, %5 : vector<32x32xf32>
    %c1 = arith.constant 1 : index
    %c0_6 = arith.constant 0 : index
    %c0_7 = arith.constant 0 : index
    %7 = vector.load %arg1[%c1, %c0_6, %c0_7] : memref<4x32x512xf32, #tpu.memory_space<vmem>>, vector<1x32x512xf32>
    %8 = vector.shape_cast %7 : vector<1x32x512xf32> to vector<32x512xf32>
    %cst_8 = arith.constant dense<0.000000e+00> : vector<32x32xf32>
    %9 = tpu.matmul %8, %0, %cst_8 {dimension_numbers = #tpu.dot_dimension_numbers<[1], [0], [0], [1], [0, 0, 1, 1], [], []>} : vector<32x512xf32>, vector<512x32xf32>, vector<32x32xf32> -> vector<32x32xf32>
    %10 = vector.broadcast %1 : vector<1x32xf32> to vector<32x32xf32>
    %11 = arith.addf %9, %10 : vector<32x32xf32>
    %12 = arith.maximumf %6, %11 : vector<32x32xf32>
    %c2 = arith.constant 2 : index
    %c0_9 = arith.constant 0 : index
    %c0_10 = arith.constant 0 : index
    %13 = vector.load %arg1[%c2, %c0_9, %c0_10] : memref<4x32x512xf32, #tpu.memory_space<vmem>>, vector<1x32x512xf32>
    %14 = vector.shape_cast %13 : vector<1x32x512xf32> to vector<32x512xf32>
    %cst_11 = arith.constant dense<0.000000e+00> : vector<32x32xf32>
    %15 = tpu.matmul %14, %0, %cst_11 {dimension_numbers = #tpu.dot_dimension_numbers<[1], [0], [0], [1], [0, 0, 1, 1], [], []>} : vector<32x512xf32>, vector<512x32xf32>, vector<32x32xf32> -> vector<32x32xf32>
    %16 = vector.broadcast %1 : vector<1x32xf32> to vector<32x32xf32>
    %17 = arith.addf %15, %16 : vector<32x32xf32>
    %18 = arith.maximumf %12, %17 : vector<32x32xf32>
    %c3 = arith.constant 3 : index
    %c0_12 = arith.constant 0 : index
    %c0_13 = arith.constant 0 : index
    %19 = vector.load %arg1[%c3, %c0_12, %c0_13] : memref<4x32x512xf32, #tpu.memory_space<vmem>>, vector<1x32x512xf32>
    %20 = vector.shape_cast %19 : vector<1x32x512xf32> to vector<32x512xf32>
    %cst_14 = arith.constant dense<0.000000e+00> : vector<32x32xf32>
    %21 = tpu.matmul %20, %0, %cst_14 {dimension_numbers = #tpu.dot_dimension_numbers<[1], [0], [0], [1], [0, 0, 1, 1], [], []>} : vector<32x512xf32>, vector<512x32xf32>, vector<32x32xf32> -> vector<32x32xf32>
    %22 = vector.broadcast %1 : vector<1x32xf32> to vector<32x32xf32>
    %23 = arith.addf %21, %22 : vector<32x32xf32>
    %24 = arith.maximumf %18, %23 : vector<32x32xf32>
    %cst_15 = arith.constant 0.000000e+00 : f32
    %25 = vector.broadcast %cst_15 : f32 to vector<32x32xf32>
    %26 = arith.maximumf %24, %25 : vector<32x32xf32>
    %c0_16 = arith.constant 0 : index
    %c0_17 = arith.constant 0 : index
    %27 = vector.load %arg4[%c0_16, %c0_17] : memref<32x32xf32, #tpu.memory_space<vmem>>, vector<32x32xf32>
    tpu.vector_store %arg4[%c0_16, %c0_17], %26 {strides = array<i32>} : memref<32x32xf32, #tpu.memory_space<vmem>>, vector<32x32xf32>,
    return
  }
  func.func @transform_0(%arg0: i32) -> (i32, i32, i32) {
    %c0_i32 = arith.constant 0 : i32
    %c0_i32_0 = arith.constant 0 : i32
    %c0_i32_1 = arith.constant 0 : i32
    return %c0_i32, %arg0, %c0_i32_0 : i32, i32, i32
  }
  func.func @transform_1(%arg0: i32) -> (i32, i32) {
    %c0_i32 = arith.constant 0 : i32
    %c0_i32_0 = arith.constant 0 : i32
    %c0_i32_1 = arith.constant 0 : i32
    return %c0_i32, %c0_i32_0 : i32, i32
  }
  func.func @transform_2(%arg0: i32) -> (i32, i32) {
    %c0_i32 = arith.constant 0 : i32
    %c0_i32_0 = arith.constant 0 : i32
    %c0_i32_1 = arith.constant 0 : i32
    return %c0_i32, %c0_i32_0 : i32, i32
  }
  func.func @transform_3(%arg0: i32) -> (i32, i32) {
    %c0_i32 = arith.constant 0 : i32
    %c0_i32_0 = arith.constant 0 : i32
    return %arg0, %c0_i32 : i32, i32
  }
}

module attributes {stable_mosaic.version = 11 : i64} {
  func.func @_head_kernel(%arg0: i32, %arg1: memref<2x288xf32, #tpu.memory_space<vmem>>, %arg2: memref<2x8xf32, #tpu.memory_space<vmem>>, %arg3: memref<288x32xf32, #tpu.memory_space<vmem>>, %arg4: memref<1x32xf32, #tpu.memory_space<vmem>>, %arg5: memref<8x12xf32, #tpu.memory_space<vmem>>, %arg6: memref<1x12xf32, #tpu.memory_space<vmem>>, %arg7: memref<32x256xf32, #tpu.memory_space<vmem>>, %arg8: memref<12x256xf32, #tpu.memory_space<vmem>>, %arg9: memref<1x256xf32, #tpu.memory_space<vmem>>, %arg10: memref<256x7xf32, #tpu.memory_space<vmem>>, %arg11: memref<1x7xf32, #tpu.memory_space<vmem>>, %arg12: memref<2x6xf32, #tpu.memory_space<vmem>>) attributes {dimension_semantics = [#tpu.dimension_semantics<arbitrary>], iteration_bounds = array<i64: 1>, scalar_prefetch = 0 : i64, scratch_operands = 0 : i64, tpu.core_type = #tpu.core_type<tc>, window_params = [{pipeline_mode = #tpu.pipeline_mode<synchronous>, transform_indices = @transform_0, window_bounds = array<i64: 2, 288>}, {pipeline_mode = #tpu.pipeline_mode<synchronous>, transform_indices = @transform_1, window_bounds = array<i64: 2, 8>}, {pipeline_mode = #tpu.pipeline_mode<synchronous>, transform_indices = @transform_2, window_bounds = array<i64: 288, 32>}, {pipeline_mode = #tpu.pipeline_mode<synchronous>, transform_indices = @transform_3, window_bounds = array<i64: 1, 32>}, {pipeline_mode = #tpu.pipeline_mode<synchronous>, transform_indices = @transform_4, window_bounds = array<i64: 8, 12>}, {pipeline_mode = #tpu.pipeline_mode<synchronous>, transform_indices = @transform_5, window_bounds = array<i64: 1, 12>}, {pipeline_mode = #tpu.pipeline_mode<synchronous>, transform_indices = @transform_6, window_bounds = array<i64: 32, 256>}, {pipeline_mode = #tpu.pipeline_mode<synchronous>, transform_indices = @transform_7, window_bounds = array<i64: 12, 256>}, {pipeline_mode = #tpu.pipeline_mode<synchronous>, transform_indices = @transform_8, window_bounds = array<i64: 1, 256>}, {pipeline_mode = #tpu.pipeline_mode<synchronous>, transform_indices = @transform_9, window_bounds = array<i64: 256, 7>}, {pipeline_mode = #tpu.pipeline_mode<synchronous>, transform_indices = @transform_10, window_bounds = array<i64: 1, 7>}, {pipeline_mode = #tpu.pipeline_mode<synchronous>, transform_indices = @transform_11, window_bounds = array<i64: 2, 6>}]} {
    %c0 = arith.constant 0 : index
    %c0_0 = arith.constant 0 : index
    %0 = vector.load %arg1[%c0, %c0_0] : memref<2x288xf32, #tpu.memory_space<vmem>>, vector<2x288xf32>
    %c0_1 = arith.constant 0 : index
    %c0_2 = arith.constant 0 : index
    %1 = vector.load %arg3[%c0_1, %c0_2] : memref<288x32xf32, #tpu.memory_space<vmem>>, vector<288x32xf32>
    %cst = arith.constant dense<0.000000e+00> : vector<2x32xf32>
    %2 = tpu.matmul %0, %1, %cst {dimension_numbers = #tpu.dot_dimension_numbers<[1], [0], [0], [1], [0, 0, 1, 1], [], []>} : vector<2x288xf32>, vector<288x32xf32>, vector<2x32xf32> -> vector<2x32xf32>
    %c0_3 = arith.constant 0 : index
    %c0_4 = arith.constant 0 : index
    %3 = vector.load %arg4[%c0_3, %c0_4] : memref<1x32xf32, #tpu.memory_space<vmem>>, vector<1x32xf32>
    %4 = vector.broadcast %3 : vector<1x32xf32> to vector<2x32xf32>
    %5 = arith.addf %2, %4 : vector<2x32xf32>
    %cst_5 = arith.constant 0.000000e+00 : f32
    %6 = vector.broadcast %cst_5 : f32 to vector<2x32xf32>
    %7 = arith.maximumf %5, %6 : vector<2x32xf32>
    %c0_6 = arith.constant 0 : index
    %c0_7 = arith.constant 0 : index
    %8 = vector.load %arg2[%c0_6, %c0_7] : memref<2x8xf32, #tpu.memory_space<vmem>>, vector<2x8xf32>
    %c0_8 = arith.constant 0 : index
    %c0_9 = arith.constant 0 : index
    %9 = vector.load %arg5[%c0_8, %c0_9] : memref<8x12xf32, #tpu.memory_space<vmem>>, vector<8x12xf32>
    %cst_10 = arith.constant dense<0.000000e+00> : vector<2x12xf32>
    %10 = tpu.matmul %8, %9, %cst_10 {dimension_numbers = #tpu.dot_dimension_numbers<[1], [0], [0], [1], [0, 0, 1, 1], [], []>} : vector<2x8xf32>, vector<8x12xf32>, vector<2x12xf32> -> vector<2x12xf32>
    %c0_11 = arith.constant 0 : index
    %c0_12 = arith.constant 0 : index
    %11 = vector.load %arg6[%c0_11, %c0_12] : memref<1x12xf32, #tpu.memory_space<vmem>>, vector<1x12xf32>
    %12 = vector.broadcast %11 : vector<1x12xf32> to vector<2x12xf32>
    %13 = arith.addf %10, %12 : vector<2x12xf32>
    %cst_13 = arith.constant 0.000000e+00 : f32
    %14 = vector.broadcast %cst_13 : f32 to vector<2x12xf32>
    %15 = arith.maximumf %13, %14 : vector<2x12xf32>
    %c0_14 = arith.constant 0 : index
    %c0_15 = arith.constant 0 : index
    %16 = vector.load %arg7[%c0_14, %c0_15] : memref<32x256xf32, #tpu.memory_space<vmem>>, vector<32x256xf32>
    %cst_16 = arith.constant dense<0.000000e+00> : vector<2x256xf32>
    %17 = tpu.matmul %7, %16, %cst_16 {dimension_numbers = #tpu.dot_dimension_numbers<[1], [0], [0], [1], [0, 0, 1, 1], [], []>} : vector<2x32xf32>, vector<32x256xf32>, vector<2x256xf32> -> vector<2x256xf32>
    %c0_17 = arith.constant 0 : index
    %c0_18 = arith.constant 0 : index
    %18 = vector.load %arg8[%c0_17, %c0_18] : memref<12x256xf32, #tpu.memory_space<vmem>>, vector<12x256xf32>
    %cst_19 = arith.constant dense<0.000000e+00> : vector<2x256xf32>
    %19 = tpu.matmul %15, %18, %cst_19 {dimension_numbers = #tpu.dot_dimension_numbers<[1], [0], [0], [1], [0, 0, 1, 1], [], []>} : vector<2x12xf32>, vector<12x256xf32>, vector<2x256xf32> -> vector<2x256xf32>
    %20 = arith.addf %17, %19 : vector<2x256xf32>
    %c0_20 = arith.constant 0 : index
    %c0_21 = arith.constant 0 : index
    %21 = vector.load %arg9[%c0_20, %c0_21] : memref<1x256xf32, #tpu.memory_space<vmem>>, vector<1x256xf32>
    %22 = vector.broadcast %21 : vector<1x256xf32> to vector<2x256xf32>
    %23 = arith.addf %20, %22 : vector<2x256xf32>
    %cst_22 = arith.constant 0.000000e+00 : f32
    %24 = vector.broadcast %cst_22 : f32 to vector<2x256xf32>
    %25 = arith.maximumf %23, %24 : vector<2x256xf32>
    %c0_23 = arith.constant 0 : index
    %c0_24 = arith.constant 0 : index
    %26 = vector.load %arg10[%c0_23, %c0_24] : memref<256x7xf32, #tpu.memory_space<vmem>>, vector<256x7xf32>
    %cst_25 = arith.constant dense<0.000000e+00> : vector<2x7xf32>
    %27 = tpu.matmul %25, %26, %cst_25 {dimension_numbers = #tpu.dot_dimension_numbers<[1], [0], [0], [1], [0, 0, 1, 1], [], []>} : vector<2x256xf32>, vector<256x7xf32>, vector<2x7xf32> -> vector<2x7xf32>
    %c0_26 = arith.constant 0 : index
    %c0_27 = arith.constant 0 : index
    %28 = vector.load %arg11[%c0_26, %c0_27] : memref<1x7xf32, #tpu.memory_space<vmem>>, vector<1x7xf32>
    %29 = vector.broadcast %28 : vector<1x7xf32> to vector<2x7xf32>
    %30 = arith.addf %27, %29 : vector<2x7xf32>
    %31 = vector.extract_strided_slice %30 {offsets = [0, 0], sizes = [2, 1], strides = [1, 1]} : vector<2x7xf32> to vector<2x1xf32>
    %32 = vector.extract_strided_slice %30 {offsets = [0, 1], sizes = [2, 6], strides = [1, 1]} : vector<2x7xf32> to vector<2x6xf32>
    %33 = vector.shape_cast %32 : vector<2x6xf32> to vector<1x2x6xf32>
    %cst_28 = arith.constant dense<0.000000e+00> : vector<1xf32>
    %34 = vector.multi_reduction <add>, %33, %cst_28 [1, 2] : vector<1x2x6xf32> to vector<1xf32>
    %35 = vector.shape_cast %34 : vector<1xf32> to vector<1x1x1xf32>
    %36 = vector.extract %35[0, 0, 0] : f32 from vector<1x1x1xf32>
    %cst_29 = arith.constant 0.0833333358 : f32
    %37 = arith.mulf %36, %cst_29 : f32
    %38 = vector.broadcast %31 : vector<2x1xf32> to vector<2x6xf32>
    %39 = arith.addf %38, %32 : vector<2x6xf32>
    %40 = vector.broadcast %37 : f32 to vector<2x6xf32>
    %41 = arith.subf %39, %40 : vector<2x6xf32>
    %c0_30 = arith.constant 0 : index
    %c0_31 = arith.constant 0 : index
    %42 = vector.load %arg12[%c0_30, %c0_31] : memref<2x6xf32, #tpu.memory_space<vmem>>, vector<2x6xf32>
    tpu.vector_store %arg12[%c0_30, %c0_31], %41 {strides = array<i32>} : memref<2x6xf32, #tpu.memory_space<vmem>>, vector<2x6xf32>,
    return
  }
  func.func @transform_0(%arg0: i32) -> (i32, i32) {
    %c0_i32 = arith.constant 0 : i32
    %c0_i32_0 = arith.constant 0 : i32
    %c0_i32_1 = arith.constant 0 : i32
    return %c0_i32, %c0_i32_0 : i32, i32
  }
  func.func @transform_1(%arg0: i32) -> (i32, i32) {
    %c0_i32 = arith.constant 0 : i32
    %c0_i32_0 = arith.constant 0 : i32
    %c0_i32_1 = arith.constant 0 : i32
    return %c0_i32, %c0_i32_0 : i32, i32
  }
  func.func @transform_2(%arg0: i32) -> (i32, i32) {
    %c0_i32 = arith.constant 0 : i32
    %c0_i32_0 = arith.constant 0 : i32
    %c0_i32_1 = arith.constant 0 : i32
    return %c0_i32, %c0_i32_0 : i32, i32
  }
  func.func @transform_3(%arg0: i32) -> (i32, i32) {
    %c0_i32 = arith.constant 0 : i32
    %c0_i32_0 = arith.constant 0 : i32
    %c0_i32_1 = arith.constant 0 : i32
    return %c0_i32, %c0_i32_0 : i32, i32
  }
  func.func @transform_4(%arg0: i32) -> (i32, i32) {
    %c0_i32 = arith.constant 0 : i32
    %c0_i32_0 = arith.constant 0 : i32
    %c0_i32_1 = arith.constant 0 : i32
    return %c0_i32, %c0_i32_0 : i32, i32
  }
  func.func @transform_5(%arg0: i32) -> (i32, i32) {
    %c0_i32 = arith.constant 0 : i32
    %c0_i32_0 = arith.constant 0 : i32
    %c0_i32_1 = arith.constant 0 : i32
    return %c0_i32, %c0_i32_0 : i32, i32
  }
  func.func @transform_6(%arg0: i32) -> (i32, i32) {
    %c0_i32 = arith.constant 0 : i32
    %c0_i32_0 = arith.constant 0 : i32
    %c0_i32_1 = arith.constant 0 : i32
    return %c0_i32, %c0_i32_0 : i32, i32
  }
  func.func @transform_7(%arg0: i32) -> (i32, i32) {
    %c0_i32 = arith.constant 0 : i32
    %c0_i32_0 = arith.constant 0 : i32
    %c0_i32_1 = arith.constant 0 : i32
    return %c0_i32, %c0_i32_0 : i32, i32
  }
  func.func @transform_8(%arg0: i32) -> (i32, i32) {
    %c0_i32 = arith.constant 0 : i32
    %c0_i32_0 = arith.constant 0 : i32
    %c0_i32_1 = arith.constant 0 : i32
    return %c0_i32, %c0_i32_0 : i32, i32
  }
  func.func @transform_9(%arg0: i32) -> (i32, i32) {
    %c0_i32 = arith.constant 0 : i32
    %c0_i32_0 = arith.constant 0 : i32
    %c0_i32_1 = arith.constant 0 : i32
    return %c0_i32, %c0_i32_0 : i32, i32
  }
  func.func @transform_10(%arg0: i32) -> (i32, i32) {
    %c0_i32 = arith.constant 0 : i32
    %c0_i32_0 = arith.constant 0 : i32
    %c0_i32_1 = arith.constant 0 : i32
    return %c0_i32, %c0_i32_0 : i32, i32
  }
  func.func @transform_11(%arg0: i32) -> (i32, i32) {
    %c0_i32 = arith.constant 0 : i32
    %c0_i32_0 = arith.constant 0 : i32
    %c0_i32_1 = arith.constant 0 : i32
    return %c0_i32, %c0_i32_0 : i32, i32
  }
}

</mosaic_0001>

<bundles_post_ra>
// kernel: forward.3
= control target key start
LH: loop header
LB: loop body
LE: loop exit
PB: predicated region body
PF: predicated region fallthrough
CT: control target
= control target key end

     0   :  { %vm90_vm0 = vcmask 523264   ;;  %vm556_vm1 = vcmask 261120   ;;  %s1339_s1 = inlined_call_operand.vmem [shape: f32[64,32], index: 1, kind: input, shape index: {}]   ;;  %s1340_s0 = inlined_call_operand.vmem [shape: f32[512,64], index: 0, kind: input, shape index: {}]   ;;  %s1341_s2 = inlined_call_operand.vmem [shape: f32[1,32], index: 2, kind: input, shape index: {}]   ;;  %s1342_s3 = inlined_call_operand.vmem [shape: f32[512,32], index: 3, kind: output, shape index: {}]  }
   0x1   :  { %v85_v0 = vld [vmem:[%s1339_s1 + $0x38] sm:$0xff]  ;;  %v84_v1 = vld [vmem:[%s1339_s1 + $0x30] sm:$0xff]  ;;  %v83_v2 = vld [vmem:[%s1339_s1 + $0x28] sm:$0xff] }
   0x2   :  { %690 = vmatpush.msra.mxu2 %v85_v0  ;;  %691 = vmatpush.msra.mxu3 %v85_v0  ;;  %v82_v3 = vld [vmem:[%s1339_s1 + $0x20] sm:$0xff]  ;;  %v81_v4 = vld [vmem:[%s1339_s1 + $0x18] sm:$0xff]  ;;  %v80_v5 = vld [vmem:[%s1339_s1 + $0x10] sm:$0xff] }
   0x3   :  { %291 = vmatpush.msra.mxu0 %v85_v0  ;;  %689 = vmatpush.msra.mxu1 %v85_v0  ;;  %v79_v6 = vld [vmem:[%s1339_s1 + $0x8] sm:$0xff]  ;;  %v78_v7 = vld [vmem:[%s1339_s1] sm:$0xff]  ;;  %v48_v16 = vld [vmem:[%s1340_s0 + $0x110] sm:$0xff] }
   0x4   :  { %693 = vmatpush.msra.mxu2 %v84_v1  ;;  %694 = vmatpush.msra.mxu3 %v84_v1  ;;  %v46_v8 = vld [vmem:[%s1340_s0 + $0x100] sm:$0xff]  ;;  %v47_v12 = vld [vmem:[%s1340_s0 + $0x108] sm:$0xff]  ;;  %v64_v17 = vld [vmem:[%s1340_s0 + $0x190] sm:$0xff] }
   0x5   :  { %292 = vmatpush.msra.mxu0 %v84_v1  ;;  %692 = vmatpush.msra.mxu1 %v84_v1  ;;  %v62_v9 = vld [vmem:[%s1340_s0 + $0x180] sm:$0xff]  ;;  %v63_v13 = vld [vmem:[%s1340_s0 + $0x188] sm:$0xff]  ;;  %v16_v18 = vld [vmem:[%s1340_s0 + $0x10] sm:$0xff] }
   0x6   :  { %696 = vmatpush.msra.mxu2 %v83_v2  ;;  %697 = vmatpush.msra.mxu3 %v83_v2  ;;  %v14_v10 = vld [vmem:[%s1340_s0] sm:$0xff]  ;;  %v15_v14 = vld [vmem:[%s1340_s0 + $0x8] sm:$0xff]  ;;  %v32_v19 = vld [vmem:[%s1340_s0 + $0x90] sm:$0xff] }
   0x7   :  { %293 = vmatpush.msra.mxu0 %v83_v2  ;;  %695 = vmatpush.msra.mxu1 %v83_v2  ;;  %v30_v11 = vld [vmem:[%s1340_s0 + $0x80] sm:$0xff]  ;;  %v31_v15 = vld [vmem:[%s1340_s0 + $0x88] sm:$0xff]  ;;  %v49_v20 = vld [vmem:[%s1340_s0 + $0x118] sm:$0xff] }
   0x8   :  { %699 = vmatpush.msra.mxu2 %v82_v3  ;;  %700 = vmatpush.msra.mxu3 %v82_v3  ;;  %v65_v21 = vld [vmem:[%s1340_s0 + $0x198] sm:$0xff]  ;;  %v50_v24 = vld [vmem:[%s1340_s0 + $0x120] sm:$0xff]  ;;  %v51_v28 = vld [vmem:[%s1340_s0 + $0x128] sm:$0xff] }
   0x9   :  { %294 = vmatpush.msra.mxu0 %v82_v3  ;;  %698 = vmatpush.msra.mxu1 %v82_v3  ;;  %v17_v22 = vld [vmem:[%s1340_s0 + $0x18] sm:$0xff]  ;;  %v66_v25 = vld [vmem:[%s1340_s0 + $0x1a0] sm:$0xff]  ;;  %v67_v29 = vld [vmem:[%s1340_s0 + $0x1a8] sm:$0xff] }
   0xa   :  { %702 = vmatpush.msra.mxu2 %v81_v4  ;;  %703 = vmatpush.msra.mxu3 %v81_v4  ;;  %v33_v23 = vld [vmem:[%s1340_s0 + $0x98] sm:$0xff]  ;;  %v18_v26 = vld [vmem:[%s1340_s0 + $0x20] sm:$0xff]  ;;  %v19_v30 = vld [vmem:[%s1340_s0 + $0x28] sm:$0xff] }
   0xb   :  { %295 = vmatpush.msra.mxu0 %v81_v4  ;;  %701 = vmatpush.msra.mxu1 %v81_v4  ;;  %v34_v27 = vld [vmem:[%s1340_s0 + $0xa0] sm:$0xff]  ;;  %v35_v31 = vld [vmem:[%s1340_s0 + $0xa8] sm:$0xff]  ;;  %v52_v32 = vld [vmem:[%s1340_s0 + $0x130] sm:$0xff] }
   0xc   :  { %705 = vmatpush.msra.mxu2 %v80_v5  ;;  %706 = vmatpush.msra.mxu3 %v80_v5  ;;  %v68_v33 = vld [vmem:[%s1340_s0 + $0x1b0] sm:$0xff]  ;;  %v53_v36 = vld [vmem:[%s1340_s0 + $0x138] sm:$0xff]  ;;  %v54_v40 = vld [vmem:[%s1340_s0 + $0x140] sm:$0xff] }
   0xd   :  { %296 = vmatpush.msra.mxu0 %v80_v5  ;;  %704 = vmatpush.msra.mxu1 %v80_v5  ;;  %v20_v34 = vld [vmem:[%s1340_s0 + $0x30] sm:$0xff]  ;;  %v69_v37 = vld [vmem:[%s1340_s0 + $0x1b8] sm:$0xff]  ;;  %v70_v41 = vld [vmem:[%s1340_s0 + $0x1c0] sm:$0xff] }
   0xe   :  { %708 = vmatpush.msra.mxu2 %v79_v6  ;;  %709 = vmatpush.msra.mxu3 %v79_v6  ;;  %v36_v35 = vld [vmem:[%s1340_s0 + $0xb0] sm:$0xff]  ;;  %v21_v38 = vld [vmem:[%s1340_s0 + $0x38] sm:$0xff]  ;;  %v22_v42 = vld [vmem:[%s1340_s0 + $0x40] sm:$0xff] }
   0xf   :  { %297 = vmatpush.msra.mxu0 %v79_v6  ;;  %707 = vmatpush.msra.mxu1 %v79_v6  ;;  %v37_v39 = vld [vmem:[%s1340_s0 + $0xb8] sm:$0xff]  ;;  %v38_v43 = vld [vmem:[%s1340_s0 + $0xc0] sm:$0xff]  ;;  %v55_v44 = vld [vmem:[%s1340_s0 + $0x148] sm:$0xff] }
  0x10   :  { %711 = vmatpush.msra.mxu2 %v78_v7  ;;  %712 = vmatpush.msra.mxu3 %v78_v7  ;;  %v71_v45 = vld [vmem:[%s1340_s0 + $0x1c8] sm:$0xff]  ;;  %v56_v48 = vld [vmem:[%s1340_s0 + $0x150] sm:$0xff]  ;;  %v57_v52 = vld [vmem:[%s1340_s0 + $0x158] sm:$0xff] }
  0x11   :  { %657 = vmatmul.msk.f32.vlgmr.msra.gmra.mxu2 %vm90_vm0, %v46_v8  ;;  %673 = vmatmul.msk.f32.vlgmr.msra.gmra.mxu3 %vm90_vm0, %v62_v9  ;;  %v23_v46 = vld [vmem:[%s1340_s0 + $0x48] sm:$0xff]  ;;  %v72_v49 = vld [vmem:[%s1340_s0 + $0x1d0] sm:$0xff]  ;;  %v73_v53 = vld [vmem:[%s1340_s0 + $0x1d8] sm:$0xff] }
  0x12   :  { %298 = vmatpush.msra.mxu0 %v78_v7  ;;  %710 = vmatpush.msra.mxu1 %v78_v7  ;;  %v39_v47 = vld [vmem:[%s1340_s0 + $0xc8] sm:$0xff]  ;;  %v24_v50 = vld [vmem:[%s1340_s0 + $0x50] sm:$0xff]  ;;  %v25_v54 = vld [vmem:[%s1340_s0 + $0x58] sm:$0xff] }
  0x13   :  { %625 = vmatmul.msk.f32.vlgmr.msra.gmra.mxu0 %vm90_vm0, %v14_v10  ;;  %641 = vmatmul.msk.f32.vlgmr.msra.gmra.mxu1 %vm90_vm0, %v30_v11  ;;  %v40_v51 = vld [vmem:[%s1340_s0 + $0xd0] sm:$0xff]  ;;  %v41_v55 = vld [vmem:[%s1340_s0 + $0xd8] sm:$0xff]  ;;  %v58_v56 = vld [vmem:[%s1340_s0 + $0x160] sm:$0xff] }
  0x14   :  { %v74_v57 = vld [vmem:[%s1340_s0 + $0x1e0] sm:$0xff]  ;;  %v59_v60 = vld [vmem:[%s1340_s0 + $0x168] sm:$0xff]  ;;  %v60_v0 = vld [vmem:[%s1340_s0 + $0x170] sm:$0xff] }
  0x15   :  { %v26_v58 = vld [vmem:[%s1340_s0 + $0x60] sm:$0xff]  ;;  %v75_v61 = vld [vmem:[%s1340_s0 + $0x1e8] sm:$0xff]  ;;  %v76_v1 = vld [vmem:[%s1340_s0 + $0x1f0] sm:$0xff] }
  0x16   :  { %v42_v59 = vld [vmem:[%s1340_s0 + $0xe0] sm:$0xff]  ;;  %v27_v62 = vld [vmem:[%s1340_s0 + $0x68] sm:$0xff]  ;;  %v28_v2 = vld [vmem:[%s1340_s0 + $0x70] sm:$0xff] }
  0x17   :  { %v43_v63 = vld [vmem:[%s1340_s0 + $0xe8] sm:$0xff]  ;;  %v44_v3 = vld [vmem:[%s1340_s0 + $0xf0] sm:$0xff]  ;;  %v61_v4 = vld [vmem:[%s1340_s0 + $0x178] sm:$0xff] }
  0x18   :  { %v77_v5 = vld [vmem:[%s1340_s0 + $0x1f8] sm:$0xff]  ;;  %v1017_v8 = vld [vmem:[%s1341_s2] ss:$0 sm:$0xff] }
  0x19   :  { %658 = vmatmul.msk.f32.gmra.mxu2 %vm90_vm0, %v47_v12  ;;  %674 = vmatmul.msk.f32.gmra.mxu3 %vm90_vm0, %v63_v13  ;;  %v29_v6 = vld [vmem:[%s1340_s0 + $0x78] sm:$0xff] }
  0x1a   :  { %v45_v7 = vld [vmem:[%s1340_s0 + $0xf8] sm:$0xff] }
  0x1b   :  { %626 = vmatmul.msk.f32.gmra.mxu0 %vm90_vm0, %v15_v14  ;;  %642 = vmatmul.msk.f32.gmra.mxu1 %vm90_vm0, %v31_v15 }
  0x21   :  { %659 = vmatmul.msk.f32.gmra.mxu2 %vm90_vm0, %v48_v16  ;;  %675 = vmatmul.msk.f32.gmra.mxu3 %vm90_vm0, %v64_v17 }
  0x23   :  { %627 = vmatmul.msk.f32.gmra.mxu0 %vm90_vm0, %v16_v18  ;;  %643 = vmatmul.msk.f32.gmra.mxu1 %vm90_vm0, %v32_v19 }
  0x29   :  { %660 = vmatmul.msk.f32.gmra.mxu2 %vm90_vm0, %v49_v20  ;;  %676 = vmatmul.msk.f32.gmra.mxu3 %vm90_vm0, %v65_v21 }
  0x2b   :  { %628 = vmatmul.msk.f32.gmra.mxu0 %vm90_vm0, %v17_v22  ;;  %644 = vmatmul.msk.f32.gmra.mxu1 %vm90_vm0, %v33_v23 }
  0x31   :  { %661 = vmatmul.msk.f32.gmra.mxu2 %vm90_vm0, %v50_v24  ;;  %677 = vmatmul.msk.f32.gmra.mxu3 %vm90_vm0, %v66_v25 }
  0x33   :  { %629 = vmatmul.msk.f32.gmra.mxu0 %vm90_vm0, %v18_v26  ;;  %645 = vmatmul.msk.f32.gmra.mxu1 %vm90_vm0, %v34_v27 }
  0x39   :  { %662 = vmatmul.msk.f32.gmra.mxu2 %vm90_vm0, %v51_v28  ;;  %678 = vmatmul.msk.f32.gmra.mxu3 %vm90_vm0, %v67_v29 }
  0x3b   :  { %630 = vmatmul.msk.f32.gmra.mxu0 %vm90_vm0, %v19_v30  ;;  %646 = vmatmul.msk.f32.gmra.mxu1 %vm90_vm0, %v35_v31 }
  0x41   :  { %663 = vmatmul.msk.f32.gmra.mxu2 %vm90_vm0, %v52_v32  ;;  %679 = vmatmul.msk.f32.gmra.mxu3 %vm90_vm0, %v68_v33 }
  0x43   :  { %631 = vmatmul.msk.f32.gmra.mxu0 %vm90_vm0, %v20_v34  ;;  %647 = vmatmul.msk.f32.gmra.mxu1 %vm90_vm0, %v36_v35 }
  0x49   :  { %664 = vmatmul.msk.f32.gmra.mxu2 %vm90_vm0, %v53_v36  ;;  %680 = vmatmul.msk.f32.gmra.mxu3 %vm90_vm0, %v69_v37 }
  0x4b   :  { %632 = vmatmul.msk.f32.gmra.mxu0 %vm90_vm0, %v21_v38  ;;  %648 = vmatmul.msk.f32.gmra.mxu1 %vm90_vm0, %v37_v39 }
  0x51   :  { %665 = vmatmul.msk.f32.gmra.mxu2 %vm90_vm0, %v54_v40  ;;  %681 = vmatmul.msk.f32.gmra.mxu3 %vm90_vm0, %v70_v41 }
  0x53   :  { %633 = vmatmul.msk.f32.gmra.mxu0 %vm90_vm0, %v22_v42  ;;  %649 = vmatmul.msk.f32.gmra.mxu1 %vm90_vm0, %v38_v43 }
  0x59   :  { %666 = vmatmul.msk.f32.gmra.mxu2 %vm90_vm0, %v55_v44  ;;  %682 = vmatmul.msk.f32.gmra.mxu3 %vm90_vm0, %v71_v45 }
  0x5b   :  { %634 = vmatmul.msk.f32.gmra.mxu0 %vm90_vm0, %v23_v46  ;;  %650 = vmatmul.msk.f32.gmra.mxu1 %vm90_vm0, %v39_v47 }
  0x61   :  { %667 = vmatmul.msk.f32.gmra.mxu2 %vm90_vm0, %v56_v48  ;;  %683 = vmatmul.msk.f32.gmra.mxu3 %vm90_vm0, %v72_v49 }
  0x63   :  { %635 = vmatmul.msk.f32.gmra.mxu0 %vm90_vm0, %v24_v50  ;;  %651 = vmatmul.msk.f32.gmra.mxu1 %vm90_vm0, %v40_v51 }
  0x69   :  { %668 = vmatmul.msk.f32.gmra.mxu2 %vm90_vm0, %v57_v52  ;;  %684 = vmatmul.msk.f32.gmra.mxu3 %vm90_vm0, %v73_v53 }
  0x6b   :  { %636 = vmatmul.msk.f32.gmra.mxu0 %vm90_vm0, %v25_v54  ;;  %652 = vmatmul.msk.f32.gmra.mxu1 %vm90_vm0, %v41_v55 }
  0x71   :  { %669 = vmatmul.msk.f32.gmra.mxu2 %vm90_vm0, %v58_v56  ;;  %685 = vmatmul.msk.f32.gmra.mxu3 %vm90_vm0, %v74_v57 }
  0x73   :  { %637 = vmatmul.msk.f32.gmra.mxu0 %vm90_vm0, %v26_v58  ;;  %653 = vmatmul.msk.f32.gmra.mxu1 %vm90_vm0, %v42_v59 }
  0x79   :  { %670 = vmatmul.msk.f32.gmra.mxu2 %vm90_vm0, %v59_v60  ;;  %686 = vmatmul.msk.f32.gmra.mxu3 %vm90_vm0, %v75_v61 }
  0x7b   :  { %638 = vmatmul.msk.f32.gmra.mxu0 %vm90_vm0, %v27_v62  ;;  %654 = vmatmul.msk.f32.gmra.mxu1 %vm90_vm0, %v43_v63 }
  0x81   :  { %671 = vmatmul.msk.f32.gmra.mxu2 %vm90_vm0, %v60_v0  ;;  %687 = vmatmul.msk.f32.gmra.mxu3 %vm90_vm0, %v76_v1 }
  0x83   :  { %639 = vmatmul.msk.f32.gmra.mxu0 %vm90_vm0, %v28_v2  ;;  %655 = vmatmul.msk.f32.gmra.mxu1 %vm90_vm0, %v44_v3 }
  0x89   :  { %672 = vmatmul.msk.f32.gmra.mxu2 %vm90_vm0, %v61_v4  ;;  %688 = vmatmul.msk.f32.gmra.mxu3 %vm90_vm0, %v77_v5 }
  0x8b   :  { %640 = vmatmul.msk.f32.gmra.mxu0 %vm90_vm0, %v29_v6  ;;  %656 = vmatmul.msk.f32.gmra.mxu1 %vm90_vm0, %v45_v7 }
  0x90   :  { %v300_v9 = vpop.f32.mrf.mxu0  ;;  %v348_v10 = vpop.f32.mrf.mxu1 }
  0x91   :  { %v301_v11 = vadd.f32 %v1017_v8, %v300_v9  ;;  %v349_v12 = vadd.f32 %v1017_v8, %v348_v10 }
  0x93   :  { %v492_v13 = vmax.f32 %v301_v11, 0.0  ;;  %v508_v14 = vmax.f32 %v349_v12, 0.0 }
  0x94   :  { %v396_v15 = vpop.f32.mrf.mxu2  ;;  %v444_v16 = vpop.f32.mrf.mxu3 }
  0x95   :  { %557 = vst.msk [vmem:[%s1342_s3] sm:$0xff] %vm556_vm1, %v492_v13  ;;  %v397_v17 = vadd.f32 %v1017_v8, %v396_v15  ;;  %v445_v18 = vadd.f32 %v1017_v8, %v444_v16 }
  0x96   :  { %573 = vst.msk [vmem:[%s1342_s3 + $0x80] sm:$0xff] %vm556_vm1, %v508_v14 }
  0x97   :  { %v524_v19 = vmax.f32 %v397_v17, 0.0  ;;  %v540_v20 = vmax.f32 %v445_v18, 0.0 }
  0x98   :  { %v303_v21 = vpop.f32.mrf.mxu0  ;;  %v351_v22 = vpop.f32.mrf.mxu1 }
  0x99   :  { %589 = vst.msk [vmem:[%s1342_s3 + $0x100] sm:$0xff] %vm556_vm1, %v524_v19  ;;  %v304_v23 = vadd.f32 %v1017_v8, %v303_v21  ;;  %v352_v24 = vadd.f32 %v1017_v8, %v351_v22 }
  0x9a   :  { %605 = vst.msk [vmem:[%s1342_s3 + $0x180] sm:$0xff] %vm556_vm1, %v540_v20 }
  0x9b   :  { %v493_v25 = vmax.f32 %v304_v23, 0.0  ;;  %v509_v26 = vmax.f32 %v352_v24, 0.0 }
  0x9c   :  { %v399_v27 = vpop.f32.mrf.mxu2  ;;  %v447_v28 = vpop.f32.mrf.mxu3 }
  0x9d   :  { %558 = vst.msk [vmem:[%s1342_s3 + $0x8] sm:$0xff] %vm556_vm1, %v493_v25  ;;  %v400_v29 = vadd.f32 %v1017_v8, %v399_v27  ;;  %v448_v30 = vadd.f32 %v1017_v8, %v447_v28 }
  0x9e   :  { %574 = vst.msk [vmem:[%s1342_s3 + $0x88] sm:$0xff] %vm556_vm1, %v509_v26 }
  0x9f   :  { %v525_v31 = vmax.f32 %v400_v29, 0.0  ;;  %v541_v32 = vmax.f32 %v448_v30, 0.0 }
  0xa0   :  { %v306_v33 = vpop.f32.mrf.mxu0  ;;  %v354_v34 = vpop.f32.mrf.mxu1 }
  0xa1   :  { %590 = vst.msk [vmem:[%s1342_s3 + $0x108] sm:$0xff] %vm556_vm1, %v525_v31  ;;  %v307_v35 = vadd.f32 %v1017_v8, %v306_v33  ;;  %v355_v36 = vadd.f32 %v1017_v8, %v354_v34 }
  0xa2   :  { %606 = vst.msk [vmem:[%s1342_s3 + $0x188] sm:$0xff] %vm556_vm1, %v541_v32 }
  0xa3   :  { %v494_v37 = vmax.f32 %v307_v35, 0.0  ;;  %v510_v38 = vmax.f32 %v355_v36, 0.0 }
  0xa4   :  { %v402_v39 = vpop.f32.mrf.mxu2  ;;  %v450_v40 = vpop.f32.mrf.mxu3 }
  0xa5   :  { %559 = vst.msk [vmem:[%s1342_s3 + $0x10] sm:$0xff] %vm556_vm1, %v494_v37  ;;  %v403_v41 = vadd.f32 %v1017_v8, %v402_v39  ;;  %v451_v42 = vadd.f32 %v1017_v8, %v450_v40 }
  0xa6   :  { %575 = vst.msk [vmem:[%s1342_s3 + $0x90] sm:$0xff] %vm556_vm1, %v510_v38 }
  0xa7   :  { %v526_v43 = vmax.f32 %v403_v41, 0.0  ;;  %v542_v44 = vmax.f32 %v451_v42, 0.0 }
  0xa8   :  { %v309_v45 = vpop.f32.mrf.mxu0  ;;  %v357_v46 = vpop.f32.mrf.mxu1 }
  0xa9   :  { %591 = vst.msk [vmem:[%s1342_s3 + $0x110] sm:$0xff] %vm556_vm1, %v526_v43  ;;  %v310_v47 = vadd.f32 %v1017_v8, %v309_v45  ;;  %v358_v48 = vadd.f32 %v1017_v8, %v357_v46 }
  0xaa   :  { %607 = vst.msk [vmem:[%s1342_s3 + $0x190] sm:$0xff] %vm556_vm1, %v542_v44 }
  0xab   :  { %v495_v49 = vmax.f32 %v310_v47, 0.0  ;;  %v511_v50 = vmax.f32 %v358_v48, 0.0 }
  0xac   :  { %v405_v51 = vpop.f32.mrf.mxu2  ;;  %v453_v52 = vpop.f32.mrf.mxu3 }
  0xad   :  { %560 = vst.msk [vmem:[%s1342_s3 + $0x18] sm:$0xff] %vm556_vm1, %v495_v49  ;;  %v406_v53 = vadd.f32 %v1017_v8, %v405_v51  ;;  %v454_v54 = vadd.f32 %v1017_v8, %v453_v52 }
  0xae   :  { %576 = vst.msk [vmem:[%s1342_s3 + $0x98] sm:$0xff] %vm556_vm1, %v511_v50 }
  0xaf   :  { %v527_v55 = vmax.f32 %v406_v53, 0.0  ;;  %v543_v56 = vmax.f32 %v454_v54, 0.0 }
  0xb0   :  { %v312_v57 = vpop.f32.mrf.mxu0  ;;  %v360_v58 = vpop.f32.mrf.mxu1 }
  0xb1   :  { %592 = vst.msk [vmem:[%s1342_s3 + $0x118] sm:$0xff] %vm556_vm1, %v527_v55  ;;  %v313_v59 = vadd.f32 %v1017_v8, %v312_v57  ;;  %v361_v60 = vadd.f32 %v1017_v8, %v360_v58 }
  0xb2   :  { %608 = vst.msk [vmem:[%s1342_s3 + $0x198] sm:$0xff] %vm556_vm1, %v543_v56 }
  0xb3   :  { %v496_v61 = vmax.f32 %v313_v59, 0.0  ;;  %v512_v62 = vmax.f32 %v361_v60, 0.0 }
  0xb4   :  { %v408_v63 = vpop.f32.mrf.mxu2  ;;  %v456_v0 = vpop.f32.mrf.mxu3 }
  0xb5   :  { %561 = vst.msk [vmem:[%s1342_s3 + $0x20] sm:$0xff] %vm556_vm1, %v496_v61  ;;  %v409_v1 = vadd.f32 %v1017_v8, %v408_v63  ;;  %v457_v2 = vadd.f32 %v1017_v8, %v456_v0 }
  0xb6   :  { %577 = vst.msk [vmem:[%s1342_s3 + $0xa0] sm:$0xff] %vm556_vm1, %v512_v62 }
  0xb7   :  { %v528_v3 = vmax.f32 %v409_v1, 0.0  ;;  %v544_v4 = vmax.f32 %v457_v2, 0.0 }
  0xb8   :  { %v315_v5 = vpop.f32.mrf.mxu0  ;;  %v363_v6 = vpop.f32.mrf.mxu1 }
  0xb9   :  { %593 = vst.msk [vmem:[%s1342_s3 + $0x120] sm:$0xff] %vm556_vm1, %v528_v3  ;;  %v316_v7 = vadd.f32 %v1017_v8, %v315_v5  ;;  %v364_v9 = vadd.f32 %v1017_v8, %v363_v6 }
  0xba   :  { %609 = vst.msk [vmem:[%s1342_s3 + $0x1a0] sm:$0xff] %vm556_vm1, %v544_v4 }
  0xbb   :  { %v497_v10 = vmax.f32 %v316_v7, 0.0  ;;  %v513_v11 = vmax.f32 %v364_v9, 0.0 }
  0xbc   :  { %v411_v12 = vpop.f32.mrf.mxu2  ;;  %v459_v13 = vpop.f32.mrf.mxu3 }
  0xbd   :  { %562 = vst.msk [vmem:[%s1342_s3 + $0x28] sm:$0xff] %vm556_vm1, %v497_v10  ;;  %v412_v14 = vadd.f32 %v1017_v8, %v411_v12  ;;  %v460_v15 = vadd.f32 %v1017_v8, %v459_v13 }
  0xbe   :  { %578 = vst.msk [vmem:[%s1342_s3 + $0xa8] sm:$0xff] %vm556_vm1, %v513_v11 }
  0xbf   :  { %v529_v16 = vmax.f32 %v412_v14, 0.0  ;;  %v545_v17 = vmax.f32 %v460_v15, 0.0 }
  0xc0   :  { %v318_v18 = vpop.f32.mrf.mxu0  ;;  %v366_v19 = vpop.f32.mrf.mxu1 }
  0xc1   :  { %594 = vst.msk [vmem:[%s1342_s3 + $0x128] sm:$0xff] %vm556_vm1, %v529_v16  ;;  %v319_v20 = vadd.f32 %v1017_v8, %v318_v18  ;;  %v367_v21 = vadd.f32 %v1017_v8, %v366_v19 }
  0xc2   :  { %610 = vst.msk [vmem:[%s1342_s3 + $0x1a8] sm:$0xff] %vm556_vm1, %v545_v17 }
  0xc3   :  { %v498_v22 = vmax.f32 %v319_v20, 0.0  ;;  %v514_v23 = vmax.f32 %v367_v21, 0.0 }
  0xc4   :  { %v414_v24 = vpop.f32.mrf.mxu2  ;;  %v462_v25 = vpop.f32.mrf.mxu3 }
  0xc5   :  { %563 = vst.msk [vmem:[%s1342_s3 + $0x30] sm:$0xff] %vm556_vm1, %v498_v22  ;;  %v415_v26 = vadd.f32 %v1017_v8, %v414_v24  ;;  %v463_v27 = vadd.f32 %v1017_v8, %v462_v25 }
  0xc6   :  { %579 = vst.msk [vmem:[%s1342_s3 + $0xb0] sm:$0xff] %vm556_vm1, %v514_v23 }
  0xc7   :  { %v530_v28 = vmax.f32 %v415_v26, 0.0  ;;  %v546_v29 = vmax.f32 %v463_v27, 0.0 }
  0xc8   :  { %v321_v30 = vpop.f32.mrf.mxu0  ;;  %v369_v31 = vpop.f32.mrf.mxu1 }
  0xc9   :  { %595 = vst.msk [vmem:[%s1342_s3 + $0x130] sm:$0xff] %vm556_vm1, %v530_v28  ;;  %v322_v32 = vadd.f32 %v1017_v8, %v321_v30  ;;  %v370_v33 = vadd.f32 %v1017_v8, %v369_v31 }
  0xca   :  { %611 = vst.msk [vmem:[%s1342_s3 + $0x1b0] sm:$0xff] %vm556_vm1, %v546_v29 }
  0xcb   :  { %v499_v34 = vmax.f32 %v322_v32, 0.0  ;;  %v515_v35 = vmax.f32 %v370_v33, 0.0 }
  0xcc   :  { %v417_v36 = vpop.f32.mrf.mxu2  ;;  %v465_v37 = vpop.f32.mrf.mxu3 }
  0xcd   :  { %564 = vst.msk [vmem:[%s1342_s3 + $0x38] sm:$0xff] %vm556_vm1, %v499_v34  ;;  %v418_v38 = vadd.f32 %v1017_v8, %v417_v36  ;;  %v466_v39 = vadd.f32 %v1017_v8, %v465_v37 }
  0xce   :  { %580 = vst.msk [vmem:[%s1342_s3 + $0xb8] sm:$0xff] %vm556_vm1, %v515_v35 }
  0xcf   :  { %v531_v40 = vmax.f32 %v418_v38, 0.0  ;;  %v547_v41 = vmax.f32 %v466_v39, 0.0 }
  0xd0   :  { %v324_v42 = vpop.f32.mrf.mxu0  ;;  %v372_v43 = vpop.f32.mrf.mxu1 }
  0xd1   :  { %596 = vst.msk [vmem:[%s1342_s3 + $0x138] sm:$0xff] %vm556_vm1, %v531_v40  ;;  %v325_v44 = vadd.f32 %v1017_v8, %v324_v42  ;;  %v373_v45 = vadd.f32 %v1017_v8, %v372_v43 }
  0xd2   :  { %612 = vst.msk [vmem:[%s1342_s3 + $0x1b8] sm:$0xff] %vm556_vm1, %v547_v41 }
  0xd3   :  { %v500_v46 = vmax.f32 %v325_v44, 0.0  ;;  %v516_v47 = vmax.f32 %v373_v45, 0.0 }
  0xd4   :  { %v420_v48 = vpop.f32.mrf.mxu2  ;;  %v468_v49 = vpop.f32.mrf.mxu3 }
  0xd5   :  { %565 = vst.msk [vmem:[%s1342_s3 + $0x40] sm:$0xff] %vm556_vm1, %v500_v46  ;;  %v421_v50 = vadd.f32 %v1017_v8, %v420_v48  ;;  %v469_v51 = vadd.f32 %v1017_v8, %v468_v49 }
  0xd6   :  { %581 = vst.msk [vmem:[%s1342_s3 + $0xc0] sm:$0xff] %vm556_vm1, %v516_v47 }
  0xd7   :  { %v532_v52 = vmax.f32 %v421_v50, 0.0  ;;  %v548_v53 = vmax.f32 %v469_v51, 0.0 }
  0xd8   :  { %v327_v54 = vpop.f32.mrf.mxu0  ;;  %v375_v55 = vpop.f32.mrf.mxu1 }
  0xd9   :  { %597 = vst.msk [vmem:[%s1342_s3 + $0x140] sm:$0xff] %vm556_vm1, %v532_v52  ;;  %v328_v56 = vadd.f32 %v1017_v8, %v327_v54  ;;  %v376_v57 = vadd.f32 %v1017_v8, %v375_v55 }
  0xda   :  { %613 = vst.msk [vmem:[%s1342_s3 + $0x1c0] sm:$0xff] %vm556_vm1, %v548_v53 }
  0xdb   :  { %v501_v58 = vmax.f32 %v328_v56, 0.0  ;;  %v517_v59 = vmax.f32 %v376_v57, 0.0 }
  0xdc   :  { %v423_v60 = vpop.f32.mrf.mxu2  ;;  %v471_v61 = vpop.f32.mrf.mxu3 }
  0xdd   :  { %566 = vst.msk [vmem:[%s1342_s3 + $0x48] sm:$0xff] %vm556_vm1, %v501_v58  ;;  %v424_v62 = vadd.f32 %v1017_v8, %v423_v60  ;;  %v472_v63 = vadd.f32 %v1017_v8, %v471_v61 }
  0xde   :  { %582 = vst.msk [vmem:[%s1342_s3 + $0xc8] sm:$0xff] %vm556_vm1, %v517_v59 }
  0xdf   :  { %v533_v0 = vmax.f32 %v424_v62, 0.0  ;;  %v549_v1 = vmax.f32 %v472_v63, 0.0 }
  0xe0   :  { %v330_v2 = vpop.f32.mrf.mxu0  ;;  %v378_v3 = vpop.f32.mrf.mxu1 }
  0xe1   :  { %598 = vst.msk [vmem:[%s1342_s3 + $0x148] sm:$0xff] %vm556_vm1, %v533_v0  ;;  %v331_v4 = vadd.f32 %v1017_v8, %v330_v2  ;;  %v379_v5 = vadd.f32 %v1017_v8, %v378_v3 }
  0xe2   :  { %614 = vst.msk [vmem:[%s1342_s3 + $0x1c8] sm:$0xff] %vm556_vm1, %v549_v1 }
  0xe3   :  { %v502_v6 = vmax.f32 %v331_v4, 0.0  ;;  %v518_v7 = vmax.f32 %v379_v5, 0.0 }
  0xe4   :  { %v426_v9 = vpop.f32.mrf.mxu2  ;;  %v474_v10 = vpop.f32.mrf.mxu3 }
  0xe5   :  { %567 = vst.msk [vmem:[%s1342_s3 + $0x50] sm:$0xff] %vm556_vm1, %v502_v6  ;;  %v427_v11 = vadd.f32 %v1017_v8, %v426_v9  ;;  %v475_v12 = vadd.f32 %v1017_v8, %v474_v10 }
  0xe6   :  { %583 = vst.msk [vmem:[%s1342_s3 + $0xd0] sm:$0xff] %vm556_vm1, %v518_v7 }
  0xe7   :  { %v534_v13 = vmax.f32 %v427_v11, 0.0  ;;  %v550_v14 = vmax.f32 %v475_v12, 0.0 }
  0xe8   :  { %v333_v15 = vpop.f32.mrf.mxu0  ;;  %v381_v16 = vpop.f32.mrf.mxu1 }
  0xe9   :  { %599 = vst.msk [vmem:[%s1342_s3 + $0x150] sm:$0xff] %vm556_vm1, %v534_v13  ;;  %v334_v17 = vadd.f32 %v1017_v8, %v333_v15  ;;  %v382_v18 = vadd.f32 %v1017_v8, %v381_v16 }
  0xea   :  { %615 = vst.msk [vmem:[%s1342_s3 + $0x1d0] sm:$0xff] %vm556_vm1, %v550_v14 }
  0xeb   :  { %v503_v19 = vmax.f32 %v334_v17, 0.0  ;;  %v519_v20 = vmax.f32 %v382_v18, 0.0 }
  0xec   :  { %v429_v21 = vpop.f32.mrf.mxu2  ;;  %v477_v22 = vpop.f32.mrf.mxu3 }
  0xed   :  { %568 = vst.msk [vmem:[%s1342_s3 + $0x58] sm:$0xff] %vm556_vm1, %v503_v19  ;;  %v430_v23 = vadd.f32 %v1017_v8, %v429_v21  ;;  %v478_v24 = vadd.f32 %v1017_v8, %v477_v22 }
  0xee   :  { %584 = vst.msk [vmem:[%s1342_s3 + $0xd8] sm:$0xff] %vm556_vm1, %v519_v20 }
  0xef   :  { %v535_v25 = vmax.f32 %v430_v23, 0.0  ;;  %v551_v26 = vmax.f32 %v478_v24, 0.0 }
  0xf0   :  { %v336_v27 = vpop.f32.mrf.mxu0  ;;  %v384_v28 = vpop.f32.mrf.mxu1 }
  0xf1   :  { %600 = vst.msk [vmem:[%s1342_s3 + $0x158] sm:$0xff] %vm556_vm1, %v535_v25  ;;  %v337_v29 = vadd.f32 %v1017_v8, %v336_v27  ;;  %v385_v30 = vadd.f32 %v1017_v8, %v384_v28 }
  0xf2   :  { %616 = vst.msk [vmem:[%s1342_s3 + $0x1d8] sm:$0xff] %vm556_vm1, %v551_v26 }
  0xf3   :  { %v504_v31 = vmax.f32 %v337_v29, 0.0  ;;  %v520_v32 = vmax.f32 %v385_v30, 0.0 }
  0xf4   :  { %v432_v33 = vpop.f32.mrf.mxu2  ;;  %v480_v34 = vpop.f32.mrf.mxu3 }
  0xf5   :  { %569 = vst.msk [vmem:[%s1342_s3 + $0x60] sm:$0xff] %vm556_vm1, %v504_v31  ;;  %v433_v35 = vadd.f32 %v1017_v8, %v432_v33  ;;  %v481_v36 = vadd.f32 %v1017_v8, %v480_v34 }
  0xf6   :  { %585 = vst.msk [vmem:[%s1342_s3 + $0xe0] sm:$0xff] %vm556_vm1, %v520_v32 }
  0xf7   :  { %v536_v37 = vmax.f32 %v433_v35, 0.0  ;;  %v552_v38 = vmax.f32 %v481_v36, 0.0 }
  0xf8   :  { %v339_v39 = vpop.f32.mrf.mxu0  ;;  %v387_v40 = vpop.f32.mrf.mxu1 }
  0xf9   :  { %601 = vst.msk [vmem:[%s1342_s3 + $0x160] sm:$0xff] %vm556_vm1, %v536_v37  ;;  %v340_v41 = vadd.f32 %v1017_v8, %v339_v39  ;;  %v388_v42 = vadd.f32 %v1017_v8, %v387_v40 }
  0xfa   :  { %617 = vst.msk [vmem:[%s1342_s3 + $0x1e0] sm:$0xff] %vm556_vm1, %v552_v38 }
  0xfb   :  { %v505_v43 = vmax.f32 %v340_v41, 0.0  ;;  %v521_v44 = vmax.f32 %v388_v42, 0.0 }
  0xfc   :  { %v435_v45 = vpop.f32.mrf.mxu2  ;;  %v483_v46 = vpop.f32.mrf.mxu3 }
  0xfd   :  { %570 = vst.msk [vmem:[%s1342_s3 + $0x68] sm:$0xff] %vm556_vm1, %v505_v43  ;;  %v436_v47 = vadd.f32 %v1017_v8, %v435_v45  ;;  %v484_v48 = vadd.f32 %v1017_v8, %v483_v46 }
  0xfe   :  { %586 = vst.msk [vmem:[%s1342_s3 + $0xe8] sm:$0xff] %vm556_vm1, %v521_v44 }
  0xff   :  { %v537_v49 = vmax.f32 %v436_v47, 0.0  ;;  %v553_v50 = vmax.f32 %v484_v48, 0.0 }
 0x100   :  { %v342_v51 = vpop.f32.mrf.mxu0  ;;  %v390_v52 = vpop.f32.mrf.mxu1 }
 0x101   :  { %602 = vst.msk [vmem:[%s1342_s3 + $0x168] sm:$0xff] %vm556_vm1, %v537_v49  ;;  %v343_v53 = vadd.f32 %v1017_v8, %v342_v51  ;;  %v391_v54 = vadd.f32 %v1017_v8, %v390_v52 }
 0x102   :  { %618 = vst.msk [vmem:[%s1342_s3 + $0x1e8] sm:$0xff] %vm556_vm1, %v553_v50 }
 0x103   :  { %v506_v55 = vmax.f32 %v343_v53, 0.0  ;;  %v522_v56 = vmax.f32 %v391_v54, 0.0 }
 0x104   :  { %v438_v57 = vpop.f32.mrf.mxu2  ;;  %v486_v58 = vpop.f32.mrf.mxu3 }
 0x105   :  { %571 = vst.msk [vmem:[%s1342_s3 + $0x70] sm:$0xff] %vm556_vm1, %v506_v55  ;;  %v439_v59 = vadd.f32 %v1017_v8, %v438_v57  ;;  %v487_v60 = vadd.f32 %v1017_v8, %v486_v58 }
 0x106   :  { %587 = vst.msk [vmem:[%s1342_s3 + $0xf0] sm:$0xff] %vm556_vm1, %v522_v56 }
 0x107   :  { %v538_v61 = vmax.f32 %v439_v59, 0.0  ;;  %v554_v62 = vmax.f32 %v487_v60, 0.0 }
 0x108   :  { %v345_v63 = vpop.f32.mrf.mxu0  ;;  %v393_v0 = vpop.f32.mrf.mxu1 }
 0x109   :  { %603 = vst.msk [vmem:[%s1342_s3 + $0x170] sm:$0xff] %vm556_vm1, %v538_v61  ;;  %v346_v1 = vadd.f32 %v1017_v8, %v345_v63  ;;  %v394_v2 = vadd.f32 %v1017_v8, %v393_v0 }
 0x10a   :  { %619 = vst.msk [vmem:[%s1342_s3 + $0x1f0] sm:$0xff] %vm556_vm1, %v554_v62 }
 0x10b   :  { %v507_v3 = vmax.f32 %v346_v1, 0.0  ;;  %v523_v4 = vmax.f32 %v394_v2, 0.0 }
 0x10c   :  { %v441_v5 = vpop.f32.mrf.mxu2  ;;  %v489_v6 = vpop.f32.mrf.mxu3 }
 0x10d   :  { %572 = vst.msk [vmem:[%s1342_s3 + $0x78] sm:$0xff] %vm556_vm1, %v507_v3  ;;  %v442_v7 = vadd.f32 %v1017_v8, %v441_v5  ;;  %v490_v9 = vadd.f32 %v1017_v8, %v489_v6 }
 0x10e   :  { %588 = vst.msk [vmem:[%s1342_s3 + $0xf8] sm:$0xff] %vm556_vm1, %v523_v4 }
 0x10f   :  { %v539_v10 = vmax.f32 %v442_v7, 0.0  ;;  %v555_v11 = vmax.f32 %v490_v9, 0.0 }
 0x111   :  { %604 = vst.msk [vmem:[%s1342_s3 + $0x178] sm:$0xff] %vm556_vm1, %v539_v10 }
 0x112   :  { %620 = vst.msk [vmem:[%s1342_s3 + $0x1f8] sm:$0xff] %vm556_vm1, %v555_v11 }

// kernel: forward.4
= control target key start
LH: loop header
LB: loop body
LE: loop exit
PB: predicated region body
PF: predicated region fallthrough
CT: control target
= control target key end

     0   :  { %vm629_vm0 = vcmask 261120   ;;  %s1542_s1 = inlined_call_operand.vmem [shape: f32[512,32], index: 1, kind: input, shape index: {}]   ;;  %s1543_s0 = inlined_call_operand.vmem [shape: f32[4,32,512], index: 0, kind: input, shape index: {}]   ;;  %s1544_s2 = inlined_call_operand.vmem [shape: f32[1,32], index: 2, kind: input, shape index: {}]   ;;  %s1545_s3 = inlined_call_operand.vmem [shape: f32[32,32], index: 3, kind: output, shape index: {}]  }
   0x1   :  { %v710_v0 = vld [vmem:[%s1542_s1 + $0x178] sm:$0xff]  ;;  %v720_v2 = vld [vmem:[%s1542_s1 + $0x170] sm:$0xff]  ;;  %v744_v6 = vld [vmem:[%s1542_s1 + $0x168] sm:$0xff] }
   0x2   :  { %v715_v1 = vld [vmem:[%s1542_s1 + $0x78] sm:$0xff]  ;;  %156 = vmatpush.msra.mxu2 %v710_v0  ;;  %v732_v4 = vld [vmem:[%s1542_s1 + $0x70] sm:$0xff]  ;;  %v754_v8 = vld [vmem:[%s1542_s1 + $0x68] sm:$0xff] }
   0x3   :  { %98 = vmatpush.msra.mxu0 %v715_v1  ;;  %v727_v3 = vld [vmem:[%s1542_s1 + $0x1f8] sm:$0xff]  ;;  %v749_v7 = vld [vmem:[%s1542_s1 + $0x1f0] sm:$0xff]  ;;  %v766_v10 = vld [vmem:[%s1542_s1 + $0x1e8] sm:$0xff] }
   0x4   :  { %v737_v5 = vld [vmem:[%s1542_s1 + $0xf8] sm:$0xff]  ;;  %185 = vmatpush.msra.mxu3 %v727_v3  ;;  %157 = vmatpush.msra.mxu2 %v720_v2  ;;  %v761_v9 = vld [vmem:[%s1542_s1 + $0xf0] sm:$0xff]  ;;  %v773_v11 = vld [vmem:[%s1542_s1 + $0x160] sm:$0xff] }
   0x5   :  { %127 = vmatpush.msra.mxu1 %v737_v5  ;;  %99 = vmatpush.msra.mxu0 %v732_v4  ;;  %v778_v12 = vld [vmem:[%s1542_s1 + $0x60] sm:$0xff]  ;;  %v783_v13 = vld [vmem:[%s1542_s1 + $0xe8] sm:$0xff]  ;;  %v802_v16 = vld [vmem:[%s1542_s1 + $0x158] sm:$0xff] }
   0x6   :  { %186 = vmatpush.msra.mxu3 %v749_v7  ;;  %158 = vmatpush.msra.mxu2 %v744_v6  ;;  %v790_v14 = vld [vmem:[%s1542_s1 + $0x1e0] sm:$0xff]  ;;  %v807_v17 = vld [vmem:[%s1542_s1 + $0x58] sm:$0xff]  ;;  %v826_v20 = vld [vmem:[%s1542_s1 + $0x150] sm:$0xff] }
   0x7   :  { %128 = vmatpush.msra.mxu1 %v761_v9  ;;  %100 = vmatpush.msra.mxu0 %v754_v8  ;;  %v795_v15 = vld [vmem:[%s1542_s1 + $0xe0] sm:$0xff]  ;;  %v814_v18 = vld [vmem:[%s1542_s1 + $0x1d8] sm:$0xff]  ;;  %v831_v21 = vld [vmem:[%s1542_s1 + $0x50] sm:$0xff] }
   0x8   :  { %187 = vmatpush.msra.mxu3 %v766_v10  ;;  %159 = vmatpush.msra.mxu2 %v773_v11  ;;  %v819_v19 = vld [vmem:[%s1542_s1 + $0xd8] sm:$0xff]  ;;  %v838_v22 = vld [vmem:[%s1542_s1 + $0x1d0] sm:$0xff]  ;;  %v850_v24 = vld [vmem:[%s1542_s1 + $0x148] sm:$0xff] }
   0x9   :  { %129 = vmatpush.msra.mxu1 %v783_v13  ;;  %101 = vmatpush.msra.mxu0 %v778_v12  ;;  %v843_v23 = vld [vmem:[%s1542_s1 + $0xd0] sm:$0xff]  ;;  %v855_v25 = vld [vmem:[%s1542_s1 + $0x48] sm:$0xff]  ;;  %v874_v28 = vld [vmem:[%s1542_s1 + $0x140] sm:$0xff] }
   0xa   :  { %188 = vmatpush.msra.mxu3 %v790_v14  ;;  %160 = vmatpush.msra.mxu2 %v802_v16  ;;  %v862_v26 = vld [vmem:[%s1542_s1 + $0x1c8] sm:$0xff]  ;;  %v879_v29 = vld [vmem:[%s1542_s1 + $0x40] sm:$0xff]  ;;  %v898_v32 = vld [vmem:[%s1542_s1 + $0x138] sm:$0xff] }
   0xb   :  { %130 = vmatpush.msra.mxu1 %v795_v15  ;;  %102 = vmatpush.msra.mxu0 %v807_v17  ;;  %v867_v27 = vld [vmem:[%s1542_s1 + $0xc8] sm:$0xff]  ;;  %v886_v30 = vld [vmem:[%s1542_s1 + $0x1c0] sm:$0xff]  ;;  %v903_v33 = vld [vmem:[%s1542_s1 + $0x38] sm:$0xff] }
   0xc   :  { %189 = vmatpush.msra.mxu3 %v814_v18  ;;  %161 = vmatpush.msra.mxu2 %v826_v20  ;;  %v891_v31 = vld [vmem:[%s1542_s1 + $0xc0] sm:$0xff]  ;;  %v910_v34 = vld [vmem:[%s1542_s1 + $0x1b8] sm:$0xff]  ;;  %v922_v36 = vld [vmem:[%s1542_s1 + $0x130] sm:$0xff] }
   0xd   :  { %131 = vmatpush.msra.mxu1 %v819_v19  ;;  %103 = vmatpush.msra.mxu0 %v831_v21  ;;  %v915_v35 = vld [vmem:[%s1542_s1 + $0xb8] sm:$0xff]  ;;  %v927_v37 = vld [vmem:[%s1542_s1 + $0x30] sm:$0xff]  ;;  %v946_v40 = vld [vmem:[%s1542_s1 + $0x128] sm:$0xff] }
   0xe   :  { %190 = vmatpush.msra.mxu3 %v838_v22  ;;  %162 = vmatpush.msra.mxu2 %v850_v24  ;;  %v934_v38 = vld [vmem:[%s1542_s1 + $0x1b0] sm:$0xff]  ;;  %v951_v41 = vld [vmem:[%s1542_s1 + $0x28] sm:$0xff]  ;;  %v970_v44 = vld [vmem:[%s1542_s1 + $0x120] sm:$0xff] }
   0xf   :  { %132 = vmatpush.msra.mxu1 %v843_v23  ;;  %104 = vmatpush.msra.mxu0 %v855_v25  ;;  %v939_v39 = vld [vmem:[%s1542_s1 + $0xb0] sm:$0xff]  ;;  %v958_v42 = vld [vmem:[%s1542_s1 + $0x1a8] sm:$0xff]  ;;  %v975_v45 = vld [vmem:[%s1542_s1 + $0x20] sm:$0xff] }
  0x10   :  { %191 = vmatpush.msra.mxu3 %v862_v26  ;;  %163 = vmatpush.msra.mxu2 %v874_v28  ;;  %v963_v43 = vld [vmem:[%s1542_s1 + $0xa8] sm:$0xff]  ;;  %v982_v46 = vld [vmem:[%s1542_s1 + $0x1a0] sm:$0xff]  ;;  %v994_v48 = vld [vmem:[%s1542_s1 + $0x118] sm:$0xff] }
  0x11   :  { %133 = vmatpush.msra.mxu1 %v867_v27  ;;  %105 = vmatpush.msra.mxu0 %v879_v29  ;;  %1562 = vst [vmem:[#allocation2_spill] sm:$0xff] %v982_v46  ;;  %v987_v47 = vld [vmem:[%s1542_s1 + $0xa0] sm:$0xff]  ;;  %v999_v49 = vld [vmem:[%s1542_s1 + $0x18] sm:$0xff]  ;;  %v1018_v52 = vld [vmem:[%s1542_s1 + $0x110] sm:$0xff] }
  0x12   :  { %192 = vmatpush.msra.mxu3 %v886_v30  ;;  %164 = vmatpush.msra.mxu2 %v898_v32  ;;  %v1006_v50 = vld [vmem:[%s1542_s1 + $0x198] sm:$0xff]  ;;  %v1023_v53 = vld [vmem:[%s1542_s1 + $0x10] sm:$0xff]  ;;  %v1042_v56 = vld [vmem:[%s1542_s1 + $0x108] sm:$0xff] }
  0x13   :  { %134 = vmatpush.msra.mxu1 %v891_v31  ;;  %106 = vmatpush.msra.mxu0 %v903_v33  ;;  %1563 = vst [vmem:[#allocation3_spill] sm:$0xff] %v1006_v50  ;;  %v1011_v51 = vld [vmem:[%s1542_s1 + $0x98] sm:$0xff]  ;;  %v1030_v54 = vld [vmem:[%s1542_s1 + $0x190] sm:$0xff]  ;;  %v1047_v57 = vld [vmem:[%s1542_s1 + $0x8] sm:$0xff] }
  0x14   :  { %193 = vmatpush.msra.mxu3 %v910_v34  ;;  %165 = vmatpush.msra.mxu2 %v922_v36  ;;  %1564 = vst [vmem:[#allocation4_spill] sm:$0xff] %v1011_v51  ;;  %v1035_v55 = vld [vmem:[%s1542_s1 + $0x90] sm:$0xff]  ;;  %v1054_v58 = vld [vmem:[%s1542_s1 + $0x188] sm:$0xff]  ;;  %v1066_v60 = vld [vmem:[%s1542_s1 + $0x100] sm:$0xff] }
  0x15   :  { %135 = vmatpush.msra.mxu1 %v915_v35  ;;  %107 = vmatpush.msra.mxu0 %v927_v37  ;;  %1565 = vst [vmem:[#allocation5_spill] sm:$0xff] %v1035_v55  ;;  %v1059_v59 = vld [vmem:[%s1542_s1 + $0x88] sm:$0xff]  ;;  %v1071_v61 = vld [vmem:[%s1542_s1] sm:$0xff]  ;;  %v81_v62 = vld [vmem:[%s1543_s0 + $0x10] sm:$0xff] }
  0x16   :  { %194 = vmatpush.msra.mxu3 %v934_v38  ;;  %166 = vmatpush.msra.mxu2 %v946_v40  ;;  %1566 = vst [vmem:[#allocation6_spill] sm:$0xff] %v1042_v56  ;;  %v1081_v63 = vld [vmem:[%s1542_s1 + $0x180] sm:$0xff] }
  0x17   :  { %136 = vmatpush.msra.mxu1 %v939_v39  ;;  %108 = vmatpush.msra.mxu0 %v951_v41  ;;  %1567 = vst [vmem:[#allocation7_spill] sm:$0xff] %v1047_v57 }
  0x18   :  { %195 = vmatpush.msra.mxu3 %v958_v42  ;;  %167 = vmatpush.msra.mxu2 %v970_v44  ;;  %1568 = vst [vmem:[#allocation8_spill] sm:$0xff] %v1054_v58 }
  0x19   :  { %137 = vmatpush.msra.mxu1 %v963_v43  ;;  %109 = vmatpush.msra.mxu0 %v975_v45  ;;  %1569 = vst [vmem:[#allocation9_spill] sm:$0xff] %v1059_v59 }
  0x1a   :  { %196 = vmatpush.msra.mxu3 %v982_v46  ;;  %168 = vmatpush.msra.mxu2 %v994_v48  ;;  %1570 = vst [vmem:[#allocation10_spill] sm:$0xff] %v1071_v61 }
  0x1b   :  { %138 = vmatpush.msra.mxu1 %v987_v47  ;;  %110 = vmatpush.msra.mxu0 %v999_v49 }
  0x1c   :  { %197 = vmatpush.msra.mxu3 %v1006_v50  ;;  %169 = vmatpush.msra.mxu2 %v1018_v52 }
  0x1d   :  { %139 = vmatpush.msra.mxu1 %v1011_v51  ;;  %111 = vmatpush.msra.mxu0 %v1023_v53 }
  0x1e   :  { %198 = vmatpush.msra.mxu3 %v1030_v54  ;;  %170 = vmatpush.msra.mxu2 %v1042_v56 }
  0x1f   :  { %140 = vmatpush.msra.mxu1 %v1035_v55  ;;  %112 = vmatpush.msra.mxu0 %v1047_v57  ;;  %v79_v55 = vld [vmem:[%s1543_s0] sm:$0xff]  ;;  %v82_v57 = vld [vmem:[%s1543_s0 + $0x18] sm:$0xff] }
  0x20   :  { %199 = vmatpush.msra.mxu3 %v1054_v58  ;;  %171 = vmatpush.msra.mxu2 %v1066_v60 }
  0x21   :  { %141 = vmatpush.msra.mxu1 %v1059_v59  ;;  %113 = vmatpush.msra.mxu0 %v1071_v61  ;;  %v1098_v59 = vld [vmem:[%s1542_s1 + $0x80] sm:$0xff]  ;;  %v80_v61 = vld [vmem:[%s1543_s0 + $0x8] sm:$0xff] }
  0x22   :  { %172 = vmatmul.f32.vlgmr.msra.gmra.mxu2 %v81_v62  ;;  %200 = vmatpush.msra.mxu3 %v1081_v63  ;;  %v84_v62 = vld [vmem:[%s1543_s0 + $0x28] sm:$0xff] }
  0x23   :  { %289 = vmatpush.msrb.mxu2 %v710_v0  ;;  %114 = vmatmul.f32.vlgmr.msra.gmra.mxu0 %v79_v55  ;;  %v85_v55 = vld [vmem:[%s1543_s0 + $0x30] sm:$0xff] }
  0x24   :  { %201 = vmatmul.f32.vlgmr.msra.gmra.mxu3 %v82_v57  ;;  %231 = vmatpush.msrb.mxu0 %v715_v1  ;;  %v83_v57 = vld [vmem:[%s1543_s0 + $0x20] sm:$0xff] }
  0x25   :  { %290 = vmatpush.msrb.mxu2 %v720_v2  ;;  %318 = vmatpush.msrb.mxu3 %v727_v3 }
  0x26   :  { %142 = vmatpush.msra.mxu1 %v1098_v59  ;;  %232 = vmatpush.msrb.mxu0 %v732_v4 }
  0x27   :  { %143 = vmatmul.f32.vlgmr.msra.gmra.mxu1 %v80_v61  ;;  %291 = vmatpush.msrb.mxu2 %v744_v6  ;;  %v86_v61 = vld [vmem:[%s1543_s0 + $0x38] sm:$0xff] }
  0x28   :  { %260 = vmatpush.msrb.mxu1 %v737_v5  ;;  %319 = vmatpush.msrb.mxu3 %v749_v7 }
  0x29   :  { %233 = vmatpush.msrb.mxu0 %v754_v8  ;;  %292 = vmatpush.msrb.mxu2 %v773_v11 }
  0x2a   :  { %261 = vmatpush.msrb.mxu1 %v761_v9  ;;  %320 = vmatpush.msrb.mxu3 %v766_v10 }
  0x2b   :  { %175 = vmatmul.f32.gmra.mxu2 %v85_v55  ;;  %234 = vmatpush.msrb.mxu0 %v778_v12  ;;  %v89_v55 = vld [vmem:[%s1543_s0 + $0x50] sm:$0xff] }
  0x2c   :  { %262 = vmatpush.msrb.mxu1 %v783_v13  ;;  %293 = vmatpush.msrb.mxu2 %v802_v16 }
  0x2d   :  { %321 = vmatpush.msrb.mxu3 %v790_v14  ;;  %117 = vmatmul.f32.gmra.mxu0 %v83_v57  ;;  %v87_v57 = vld [vmem:[%s1543_s0 + $0x40] sm:$0xff] }
  0x2e   :  { %204 = vmatmul.f32.gmra.mxu3 %v86_v61  ;;  %235 = vmatpush.msrb.mxu0 %v807_v17  ;;  %v90_v61 = vld [vmem:[%s1543_s0 + $0x58] sm:$0xff] }
  0x2f   :  { %263 = vmatpush.msrb.mxu1 %v795_v15  ;;  %294 = vmatpush.msrb.mxu2 %v826_v20 }
  0x30   :  { %322 = vmatpush.msrb.mxu3 %v814_v18  ;;  %146 = vmatmul.f32.gmra.mxu1 %v84_v62  ;;  %v88_v62 = vld [vmem:[%s1543_s0 + $0x48] sm:$0xff] }
  0x31   :  { %236 = vmatpush.msrb.mxu0 %v831_v21  ;;  %264 = vmatpush.msrb.mxu1 %v819_v19 }
  0x32   :  { %295 = vmatpush.msrb.mxu2 %v850_v24  ;;  %323 = vmatpush.msrb.mxu3 %v838_v22 }
  0x33   :  { %237 = vmatpush.msrb.mxu0 %v855_v25  ;;  %265 = vmatpush.msrb.mxu1 %v843_v23 }
  0x34   :  { %296 = vmatpush.msrb.mxu2 %v874_v28  ;;  %324 = vmatpush.msrb.mxu3 %v862_v26 }
  0x35   :  { %178 = vmatmul.f32.gmra.mxu2 %v89_v55  ;;  %238 = vmatpush.msrb.mxu0 %v879_v29  ;;  %v93_v55 = vld [vmem:[%s1543_s0 + $0x70] sm:$0xff] }
  0x36   :  { %266 = vmatpush.msrb.mxu1 %v867_v27  ;;  %297 = vmatpush.msrb.mxu2 %v898_v32 }
  0x37   :  { %325 = vmatpush.msrb.mxu3 %v886_v30  ;;  %120 = vmatmul.f32.gmra.mxu0 %v87_v57  ;;  %v91_v57 = vld [vmem:[%s1543_s0 + $0x60] sm:$0xff] }
  0x38   :  { %207 = vmatmul.f32.gmra.mxu3 %v90_v61  ;;  %239 = vmatpush.msrb.mxu0 %v903_v33  ;;  %v94_v61 = vld [vmem:[%s1543_s0 + $0x78] sm:$0xff] }
  0x39   :  { %267 = vmatpush.msrb.mxu1 %v891_v31  ;;  %298 = vmatpush.msrb.mxu2 %v922_v36 }
  0x3a   :  { %326 = vmatpush.msrb.mxu3 %v910_v34  ;;  %149 = vmatmul.f32.gmra.mxu1 %v88_v62  ;;  %v92_v62 = vld [vmem:[%s1543_s0 + $0x68] sm:$0xff] }
  0x3b   :  { %240 = vmatpush.msrb.mxu0 %v927_v37  ;;  %268 = vmatpush.msrb.mxu1 %v915_v35 }
  0x3c   :  { %299 = vmatpush.msrb.mxu2 %v946_v40  ;;  %327 = vmatpush.msrb.mxu3 %v934_v38 }
  0x3d   :  { %241 = vmatpush.msrb.mxu0 %v951_v41  ;;  %269 = vmatpush.msrb.mxu1 %v939_v39 }
  0x3e   :  { %300 = vmatpush.msrb.mxu2 %v970_v44  ;;  %328 = vmatpush.msrb.mxu3 %v958_v42 }
  0x3f   :  { %181 = vmatmul.f32.gmra.mxu2 %v93_v55  ;;  %242 = vmatpush.msrb.mxu0 %v975_v45  ;;  %v1571_v55 = vld [vmem:[#allocation7_spill] sm:$0xff] }
  0x40   :  { %270 = vmatpush.msrb.mxu1 %v963_v43  ;;  %301 = vmatpush.msrb.mxu2 %v994_v48 }
  0x41   :  { %329 = vmatpush.msrb.mxu3 %v982_v46  ;;  %123 = vmatmul.f32.gmra.mxu0 %v91_v57  ;;  %v1572_v57 = vld [vmem:[#allocation5_spill] sm:$0xff] }
  0x42   :  { %210 = vmatmul.f32.gmra.mxu3 %v94_v61  ;;  %243 = vmatpush.msrb.mxu0 %v999_v49  ;;  %v640_v61 = vld [vmem:[%s1543_s0 + $0x90] sm:$0xff] }
  0x43   :  { %271 = vmatpush.msrb.mxu1 %v987_v47  ;;  %302 = vmatpush.msrb.mxu2 %v1018_v52 }
  0x44   :  { %330 = vmatpush.msrb.mxu3 %v1006_v50  ;;  %152 = vmatmul.f32.gmra.mxu1 %v92_v62  ;;  %v638_v62 = vld [vmem:[%s1543_s0 + $0x80] sm:$0xff] }
  0x45   :  { %244 = vmatpush.msrb.mxu0 %v1023_v53  ;;  %272 = vmatpush.msrb.mxu1 %v1011_v51  ;;  %v1573_v51 = vld [vmem:[#allocation10_spill] sm:$0xff] }
  0x46   :  { %303 = vmatpush.msrb.mxu2 %v1042_v56  ;;  %331 = vmatpush.msrb.mxu3 %v1030_v54  ;;  %v1574_v56 = vld [vmem:[#allocation9_spill] sm:$0xff] }
  0x47   :  { %245 = vmatpush.msrb.mxu0 %v1571_v55  ;;  %273 = vmatpush.msrb.mxu1 %v1572_v57  ;;  %v641_v57 = vld [vmem:[%s1543_s0 + $0x98] sm:$0xff] }
  0x48   :  { %304 = vmatpush.msrb.mxu2 %v1066_v60  ;;  %332 = vmatpush.msrb.mxu3 %v1054_v58  ;;  %v639_v58 = vld [vmem:[%s1543_s0 + $0x88] sm:$0xff] }
  0x49   :  { %246 = vmatpush.msrb.mxu0 %v1573_v51  ;;  %274 = vmatpush.msrb.mxu1 %v1574_v56 }
  0x4a   :  { %305 = vmatmul.f32.vlgmr.msrb.gmra.mxu2 %v640_v61  ;;  %333 = vmatpush.msrb.mxu3 %v1081_v63  ;;  %v644_v61 = vld [vmem:[%s1543_s0 + $0xb0] sm:$0xff] }
  0x4b   :  { %426 = vmatpush.msra.mxu2 %v710_v0  ;;  %247 = vmatmul.f32.vlgmr.msrb.gmra.mxu0 %v638_v62  ;;  %v643_v62 = vld [vmem:[%s1543_s0 + $0xa8] sm:$0xff] }
  0x4c   :  { %275 = vmatpush.msrb.mxu1 %v1098_v59  ;;  %334 = vmatmul.f32.vlgmr.msrb.gmra.mxu3 %v641_v57  ;;  %v645_v57 = vld [vmem:[%s1543_s0 + $0xb8] sm:$0xff] }
  0x4d   :  { %368 = vmatpush.msra.mxu0 %v715_v1  ;;  %427 = vmatpush.msra.mxu2 %v720_v2 }
  0x4e   :  { %455 = vmatpush.msra.mxu3 %v727_v3  ;;  %276 = vmatmul.f32.vlgmr.msrb.gmra.mxu1 %v639_v58  ;;  %v642_v58 = vld [vmem:[%s1543_s0 + $0xa0] sm:$0xff] }
  0x4f   :  { %369 = vmatpush.msra.mxu0 %v732_v4  ;;  %397 = vmatpush.msra.mxu1 %v737_v5 }
  0x50   :  { %428 = vmatpush.msra.mxu2 %v744_v6  ;;  %456 = vmatpush.msra.mxu3 %v749_v7 }
  0x51   :  { %370 = vmatpush.msra.mxu0 %v754_v8  ;;  %398 = vmatpush.msra.mxu1 %v761_v9 }
  0x52   :  { %429 = vmatpush.msra.mxu2 %v773_v11  ;;  %457 = vmatpush.msra.mxu3 %v766_v10 }
  0x53   :  { %308 = vmatmul.f32.gmra.mxu2 %v644_v61  ;;  %371 = vmatpush.msra.mxu0 %v778_v12  ;;  %v648_v61 = vld [vmem:[%s1543_s0 + $0xd0] sm:$0xff] }
  0x54   :  { %399 = vmatpush.msra.mxu1 %v783_v13  ;;  %430 = vmatpush.msra.mxu2 %v802_v16 }
  0x55   :  { %458 = vmatpush.msra.mxu3 %v790_v14  ;;  %250 = vmatmul.f32.gmra.mxu0 %v642_v58  ;;  %v646_v58 = vld [vmem:[%s1543_s0 + $0xc0] sm:$0xff] }
  0x56   :  { %337 = vmatmul.f32.gmra.mxu3 %v645_v57  ;;  %372 = vmatpush.msra.mxu0 %v807_v17  ;;  %v649_v57 = vld [vmem:[%s1543_s0 + $0xd8] sm:$0xff] }
  0x57   :  { %400 = vmatpush.msra.mxu1 %v795_v15  ;;  %431 = vmatpush.msra.mxu2 %v826_v20 }
  0x58   :  { %459 = vmatpush.msra.mxu3 %v814_v18  ;;  %279 = vmatmul.f32.gmra.mxu1 %v643_v62  ;;  %v647_v62 = vld [vmem:[%s1543_s0 + $0xc8] sm:$0xff] }
  0x59   :  { %373 = vmatpush.msra.mxu0 %v831_v21  ;;  %401 = vmatpush.msra.mxu1 %v819_v19 }
  0x5a   :  { %432 = vmatpush.msra.mxu2 %v850_v24  ;;  %460 = vmatpush.msra.mxu3 %v838_v22 }
  0x5b   :  { %374 = vmatpush.msra.mxu0 %v855_v25  ;;  %402 = vmatpush.msra.mxu1 %v843_v23 }
  0x5c   :  { %433 = vmatpush.msra.mxu2 %v874_v28  ;;  %461 = vmatpush.msra.mxu3 %v862_v26 }
  0x5d   :  { %311 = vmatmul.f32.gmra.mxu2 %v648_v61  ;;  %375 = vmatpush.msra.mxu0 %v879_v29  ;;  %v652_v61 = vld [vmem:[%s1543_s0 + $0xf0] sm:$0xff] }
  0x5e   :  { %403 = vmatpush.msra.mxu1 %v867_v27  ;;  %434 = vmatpush.msra.mxu2 %v898_v32 }
  0x5f   :  { %462 = vmatpush.msra.mxu3 %v886_v30  ;;  %253 = vmatmul.f32.gmra.mxu0 %v646_v58  ;;  %v650_v58 = vld [vmem:[%s1543_s0 + $0xe0] sm:$0xff] }
  0x60   :  { %340 = vmatmul.f32.gmra.mxu3 %v649_v57  ;;  %376 = vmatpush.msra.mxu0 %v903_v33  ;;  %v653_v57 = vld [vmem:[%s1543_s0 + $0xf8] sm:$0xff] }
  0x61   :  { %404 = vmatpush.msra.mxu1 %v891_v31  ;;  %435 = vmatpush.msra.mxu2 %v922_v36 }
  0x62   :  { %463 = vmatpush.msra.mxu3 %v910_v34  ;;  %282 = vmatmul.f32.gmra.mxu1 %v647_v62  ;;  %v651_v62 = vld [vmem:[%s1543_s0 + $0xe8] sm:$0xff] }
  0x63   :  { %377 = vmatpush.msra.mxu0 %v927_v37  ;;  %405 = vmatpush.msra.mxu1 %v915_v35 }
  0x64   :  { %436 = vmatpush.msra.mxu2 %v946_v40  ;;  %464 = vmatpush.msra.mxu3 %v934_v38 }
  0x65   :  { %378 = vmatpush.msra.mxu0 %v951_v41  ;;  %406 = vmatpush.msra.mxu1 %v939_v39 }
  0x66   :  { %437 = vmatpush.msra.mxu2 %v970_v44  ;;  %465 = vmatpush.msra.mxu3 %v958_v42 }
  0x67   :  { %314 = vmatmul.f32.gmra.mxu2 %v652_v61  ;;  %379 = vmatpush.msra.mxu0 %v975_v45  ;;  %v1575_v61 = vld [vmem:[#allocation4_spill] sm:$0xff] }
  0x68   :  { %407 = vmatpush.msra.mxu1 %v963_v43  ;;  %438 = vmatpush.msra.mxu2 %v994_v48 }
  0x69   :  { %466 = vmatpush.msra.mxu3 %v982_v46  ;;  %256 = vmatmul.f32.gmra.mxu0 %v650_v58  ;;  %v1576_v46 = vld [vmem:[#allocation6_spill] sm:$0xff]  ;;  %v1577_v58 = vld [vmem:[#allocation5_spill] sm:$0xff] }
  0x6a   :  { %343 = vmatmul.f32.gmra.mxu3 %v653_v57  ;;  %380 = vmatpush.msra.mxu0 %v999_v49  ;;  %v656_v57 = vld [vmem:[%s1543_s0 + $0x110] sm:$0xff] }
  0x6b   :  { %408 = vmatpush.msra.mxu1 %v987_v47  ;;  %439 = vmatpush.msra.mxu2 %v1018_v52 }
  0x6c   :  { %467 = vmatpush.msra.mxu3 %v1006_v50  ;;  %285 = vmatmul.f32.gmra.mxu1 %v651_v62  ;;  %v1578_v50 = vld [vmem:[#allocation8_spill] sm:$0xff]  ;;  %v654_v62 = vld [vmem:[%s1543_s0 + $0x100] sm:$0xff] }
  0x6d   :  { %381 = vmatpush.msra.mxu0 %v1023_v53  ;;  %409 = vmatpush.msra.mxu1 %v1575_v61 }
  0x6e   :  { %440 = vmatpush.msra.mxu2 %v1576_v46  ;;  %468 = vmatpush.msra.mxu3 %v1030_v54 }
  0x6f   :  { %382 = vmatpush.msra.mxu0 %v1571_v55  ;;  %410 = vmatpush.msra.mxu1 %v1577_v58  ;;  %v657_v58 = vld [vmem:[%s1543_s0 + $0x118] sm:$0xff] }
  0x70   :  { %441 = vmatpush.msra.mxu2 %v1066_v60  ;;  %469 = vmatpush.msra.mxu3 %v1578_v50  ;;  %v655_v50 = vld [vmem:[%s1543_s0 + $0x108] sm:$0xff] }
  0x71   :  { %383 = vmatpush.msra.mxu0 %v1573_v51  ;;  %411 = vmatpush.msra.mxu1 %v1574_v56 }
  0x72   :  { %442 = vmatmul.f32.vlgmr.msra.gmra.mxu2 %v656_v57  ;;  %470 = vmatpush.msra.mxu3 %v1081_v63 }
  0x73   :  { %563 = vmatpush.msrb.mxu2 %v710_v0  ;;  %384 = vmatmul.f32.vlgmr.msra.gmra.mxu0 %v654_v62  ;;  %v660_v0 = vld [vmem:[%s1543_s0 + $0x130] sm:$0xff] }
  0x74   :  { %412 = vmatpush.msra.mxu1 %v1098_v59  ;;  %471 = vmatmul.f32.vlgmr.msra.gmra.mxu3 %v657_v58 }
  0x75   :  { %505 = vmatpush.msrb.mxu0 %v715_v1  ;;  %564 = vmatpush.msrb.mxu2 %v720_v2  ;;  %v658_v1 = vld [vmem:[%s1543_s0 + $0x120] sm:$0xff]  ;;  %v661_v2 = vld [vmem:[%s1543_s0 + $0x138] sm:$0xff] }
  0x76   :  { %592 = vmatpush.msrb.mxu3 %v727_v3  ;;  %413 = vmatmul.f32.vlgmr.msra.gmra.mxu1 %v655_v50  ;;  %v659_v3 = vld [vmem:[%s1543_s0 + $0x128] sm:$0xff] }
  0x77   :  { %506 = vmatpush.msrb.mxu0 %v732_v4  ;;  %534 = vmatpush.msrb.mxu1 %v737_v5  ;;  %v664_v4 = vld [vmem:[%s1543_s0 + $0x150] sm:$0xff]  ;;  %v662_v5 = vld [vmem:[%s1543_s0 + $0x140] sm:$0xff] }
  0x78   :  { %565 = vmatpush.msrb.mxu2 %v744_v6  ;;  %593 = vmatpush.msrb.mxu3 %v749_v7  ;;  %v665_v6 = vld [vmem:[%s1543_s0 + $0x158] sm:$0xff]  ;;  %v663_v7 = vld [vmem:[%s1543_s0 + $0x148] sm:$0xff] }
  0x79   :  { %507 = vmatpush.msrb.mxu0 %v754_v8  ;;  %535 = vmatpush.msrb.mxu1 %v761_v9  ;;  %v668_v8 = vld [vmem:[%s1543_s0 + $0x170] sm:$0xff]  ;;  %v666_v9 = vld [vmem:[%s1543_s0 + $0x160] sm:$0xff] }
  0x7a   :  { %566 = vmatpush.msrb.mxu2 %v773_v11  ;;  %594 = vmatpush.msrb.mxu3 %v766_v10  ;;  %v669_v10 = vld [vmem:[%s1543_s0 + $0x178] sm:$0xff]  ;;  %v1579_v11 = vld [vmem:[#allocation2_spill] sm:$0xff] }
  0x7b   :  { %445 = vmatmul.f32.gmra.mxu2 %v660_v0  ;;  %508 = vmatpush.msrb.mxu0 %v778_v12  ;;  %v667_v12 = vld [vmem:[%s1543_s0 + $0x168] sm:$0xff] }
  0x7c   :  { %536 = vmatpush.msrb.mxu1 %v783_v13  ;;  %567 = vmatpush.msrb.mxu2 %v802_v16  ;;  %v1580_v13 = vld [vmem:[#allocation3_spill] sm:$0xff]  ;;  %v1582_v16 = vld [vmem:[#allocation8_spill] sm:$0xff] }
  0x7d   :  { %595 = vmatpush.msrb.mxu3 %v790_v14  ;;  %387 = vmatmul.f32.gmra.mxu0 %v658_v1  ;;  %v1581_v14 = vld [vmem:[#allocation5_spill] sm:$0xff] }
  0x7e   :  { %474 = vmatmul.f32.gmra.mxu3 %v661_v2  ;;  %509 = vmatpush.msrb.mxu0 %v807_v17  ;;  %v670_v17 = vld [vmem:[%s1543_s0 + $0x180] sm:$0xff] }
  0x7f   :  { %537 = vmatpush.msrb.mxu1 %v795_v15  ;;  %568 = vmatpush.msrb.mxu2 %v826_v20  ;;  %v672_v15 = vld [vmem:[%s1543_s0 + $0x190] sm:$0xff]  ;;  %v1442_v20 = vld [vmem:[%s1544_s2] ss:$0 sm:$0xff] }
  0x80   :  { %596 = vmatpush.msrb.mxu3 %v814_v18  ;;  %416 = vmatmul.f32.gmra.mxu1 %v659_v3  ;;  %v673_v18 = vld [vmem:[%s1543_s0 + $0x198] sm:$0xff] }
  0x81   :  { %510 = vmatpush.msrb.mxu0 %v831_v21  ;;  %538 = vmatpush.msrb.mxu1 %v819_v19  ;;  %v671_v19 = vld [vmem:[%s1543_s0 + $0x188] sm:$0xff]  ;;  %v676_v21 = vld [vmem:[%s1543_s0 + $0x1b0] sm:$0xff] }
  0x82   :  { %569 = vmatpush.msrb.mxu2 %v850_v24  ;;  %597 = vmatpush.msrb.mxu3 %v838_v22  ;;  %v674_v22 = vld [vmem:[%s1543_s0 + $0x1a0] sm:$0xff]  ;;  %v677_v24 = vld [vmem:[%s1543_s0 + $0x1b8] sm:$0xff] }
  0x83   :  { %511 = vmatpush.msrb.mxu0 %v855_v25  ;;  %539 = vmatpush.msrb.mxu1 %v843_v23  ;;  %v675_v25 = vld [vmem:[%s1543_s0 + $0x1a8] sm:$0xff] }
  0x84   :  { %570 = vmatpush.msrb.mxu2 %v874_v28  ;;  %598 = vmatpush.msrb.mxu3 %v862_v26 }
  0x85   :  { %448 = vmatmul.f32.gmra.mxu2 %v664_v4  ;;  %512 = vmatpush.msrb.mxu0 %v879_v29 }
  0x86   :  { %540 = vmatpush.msrb.mxu1 %v867_v27  ;;  %571 = vmatpush.msrb.mxu2 %v898_v32 }
  0x87   :  { %599 = vmatpush.msrb.mxu3 %v886_v30  ;;  %390 = vmatmul.f32.gmra.mxu0 %v662_v5  ;;  %v680_v30 = vld [vmem:[%s1543_s0 + $0x1d0] sm:$0xff] }
  0x88   :  { %477 = vmatmul.f32.gmra.mxu3 %v665_v6  ;;  %513 = vmatpush.msrb.mxu0 %v903_v33  ;;  %v678_v33 = vld [vmem:[%s1543_s0 + $0x1c0] sm:$0xff] }
  0x89   :  { %541 = vmatpush.msrb.mxu1 %v891_v31  ;;  %572 = vmatpush.msrb.mxu2 %v922_v36 }
  0x8a   :  { %600 = vmatpush.msrb.mxu3 %v910_v34  ;;  %419 = vmatmul.f32.gmra.mxu1 %v663_v7  ;;  %v681_v34 = vld [vmem:[%s1543_s0 + $0x1d8] sm:$0xff] }
  0x8b   :  { %514 = vmatpush.msrb.mxu0 %v927_v37  ;;  %542 = vmatpush.msrb.mxu1 %v915_v35  ;;  %v679_v35 = vld [vmem:[%s1543_s0 + $0x1c8] sm:$0xff] }
  0x8c   :  { %573 = vmatpush.msrb.mxu2 %v946_v40  ;;  %601 = vmatpush.msrb.mxu3 %v934_v38 }
  0x8d   :  { %515 = vmatpush.msrb.mxu0 %v951_v41  ;;  %543 = vmatpush.msrb.mxu1 %v939_v39 }
  0x8e   :  { %574 = vmatpush.msrb.mxu2 %v970_v44  ;;  %602 = vmatpush.msrb.mxu3 %v958_v42  ;;  %v684_v42 = vld [vmem:[%s1543_s0 + $0x1f0] sm:$0xff] }
  0x8f   :  { %451 = vmatmul.f32.gmra.mxu2 %v668_v8  ;;  %516 = vmatpush.msrb.mxu0 %v975_v45  ;;  %v685_v45 = vld [vmem:[%s1543_s0 + $0x1f8] sm:$0xff] }
  0x90   :  { %544 = vmatpush.msrb.mxu1 %v963_v43  ;;  %575 = vmatpush.msrb.mxu2 %v994_v48  ;;  %v682_v43 = vld [vmem:[%s1543_s0 + $0x1e0] sm:$0xff] }
  0x91   :  { %603 = vmatpush.msrb.mxu3 %v1579_v11  ;;  %393 = vmatmul.f32.gmra.mxu0 %v666_v9 }
  0x92   :  { %480 = vmatmul.f32.gmra.mxu3 %v669_v10  ;;  %517 = vmatpush.msrb.mxu0 %v999_v49 }
  0x93   :  { %545 = vmatpush.msrb.mxu1 %v987_v47  ;;  %576 = vmatpush.msrb.mxu2 %v1018_v52 }
  0x94   :  { %604 = vmatpush.msrb.mxu3 %v1580_v13  ;;  %422 = vmatmul.f32.gmra.mxu1 %v667_v12 }
  0x95   :  { %518 = vmatpush.msrb.mxu0 %v1023_v53  ;;  %546 = vmatpush.msrb.mxu1 %v1575_v61 }
  0x96   :  { %577 = vmatpush.msrb.mxu2 %v1576_v46  ;;  %605 = vmatpush.msrb.mxu3 %v1030_v54  ;;  %v683_v46 = vld [vmem:[%s1543_s0 + $0x1e8] sm:$0xff] }
  0x97   :  { %519 = vmatpush.msrb.mxu0 %v1571_v55  ;;  %547 = vmatpush.msrb.mxu1 %v1581_v14 }
  0x98   :  { %578 = vmatpush.msrb.mxu2 %v1066_v60  ;;  %606 = vmatpush.msrb.mxu3 %v1582_v16 }
  0x99   :  { %520 = vmatpush.msrb.mxu0 %v1573_v51  ;;  %548 = vmatpush.msrb.mxu1 %v1574_v56 }
  0x9a   :  { %579 = vmatmul.f32.vlgmr.msrb.gmra.mxu2 %v672_v15  ;;  %607 = vmatpush.msrb.mxu3 %v1081_v63 }
  0x9b   :  { %521 = vmatmul.f32.vlgmr.msrb.gmra.mxu0 %v670_v17  ;;  %549 = vmatpush.msrb.mxu1 %v1098_v59 }
  0x9c   :  { %608 = vmatmul.f32.vlgmr.msrb.gmra.mxu3 %v673_v18  ;;  %550 = vmatmul.f32.vlgmr.msrb.gmra.mxu1 %v671_v19 }
  0xa0   :  { %v115_v23 = vpop.f32.mrf.mxu0 }
  0xa1   :  { %v116_v26 = vadd.f32 %v1442_v20, %v115_v23 }
  0xa2   :  { %582 = vmatmul.f32.gmra.mxu2 %v676_v21 }
  0xa3   :  { %524 = vmatmul.f32.gmra.mxu0 %v674_v22 }
  0xa4   :  { %611 = vmatmul.f32.gmra.mxu3 %v677_v24  ;;  %553 = vmatmul.f32.gmra.mxu1 %v675_v25  ;;  %v144_v27 = vpop.f32.mrf.mxu1 }
  0xa5   :  { %v145_v28 = vadd.f32 %v144_v27, %v116_v26  ;;  %v173_v29 = vpop.f32.mrf.mxu2 }
  0xa7   :  { %v174_v31 = vadd.f32 %v173_v29, %v145_v28  ;;  %v202_v32 = vpop.f32.mrf.mxu3 }
  0xa9   :  { %v1469_v36 = vadd.f32 %v202_v32, %v174_v31 }
  0xaa   :  { %585 = vmatmul.f32.gmra.mxu2 %v680_v30  ;;  %v118_v37 = vpop.f32.mrf.mxu0 }
  0xab   :  { %527 = vmatmul.f32.gmra.mxu0 %v678_v33  ;;  %v119_v38 = vadd.f32 %v1442_v20, %v118_v37 }
  0xac   :  { %614 = vmatmul.f32.gmra.mxu3 %v681_v34  ;;  %556 = vmatmul.f32.gmra.mxu1 %v679_v35 }
  0xad   :  { %v147_v39 = vpop.f32.mrf.mxu1 }
  0xae   :  { %v148_v40 = vadd.f32 %v147_v39, %v119_v38  ;;  %v176_v41 = vpop.f32.mrf.mxu2 }
  0xb0   :  { %v177_v44 = vadd.f32 %v176_v41, %v148_v40 }
  0xb1   :  { %v205_v47 = vpop.f32.mrf.mxu3 }
  0xb2   :  { %588 = vmatmul.f32.gmra.mxu2 %v684_v42  ;;  %v1484_v48 = vadd.f32 %v205_v47, %v177_v44 }
  0xb3   :  { %530 = vmatmul.f32.gmra.mxu0 %v682_v43 }
  0xb4   :  { %617 = vmatmul.f32.gmra.mxu3 %v685_v45  ;;  %559 = vmatmul.f32.gmra.mxu1 %v683_v46  ;;  %v121_v49 = vpop.f32.mrf.mxu0 }
  0xb5   :  { %v122_v50 = vadd.f32 %v1442_v20, %v121_v49 }
  0xb7   :  { %v150_v51 = vpop.f32.mrf.mxu1 }
  0xb8   :  { %v151_v52 = vadd.f32 %v150_v51, %v122_v50  ;;  %v179_v53 = vpop.f32.mrf.mxu2 }
  0xba   :  { %v180_v54 = vadd.f32 %v179_v53, %v151_v52 }
  0xbb   :  { %v208_v56 = vpop.f32.mrf.mxu3 }
  0xbc   :  { %v1487_v59 = vadd.f32 %v208_v56, %v180_v54 }
  0xbe   :  { %v124_v60 = vpop.f32.mrf.mxu0 }
  0xbf   :  { %v125_v63 = vadd.f32 %v1442_v20, %v124_v60 }
  0xc1   :  { %v153_v55 = vpop.f32.mrf.mxu1 }
  0xc2   :  { %v154_v61 = vadd.f32 %v153_v55, %v125_v63  ;;  %v182_v58 = vpop.f32.mrf.mxu2 }
  0xc4   :  { %v183_v57 = vadd.f32 %v182_v58, %v154_v61 }
  0xc5   :  { %v211_v62 = vpop.f32.mrf.mxu3 }
  0xc6   :  { %v1490_v0 = vadd.f32 %v211_v62, %v183_v57 }
  0xc8   :  { %v248_v1 = vpop.f32.mrf.mxu0 }
  0xc9   :  { %v249_v30 = vadd.f32 %v1442_v20, %v248_v1 }
  0xcb   :  { %v277_v2 = vpop.f32.mrf.mxu1 }
  0xcc   :  { %v278_v34 = vadd.f32 %v277_v2, %v249_v30 }
  0xcd   :  { %v306_v3 = vpop.f32.mrf.mxu2 }
  0xce   :  { %v307_v39 = vadd.f32 %v306_v3, %v278_v34 }
  0xcf   :  { %v335_v4 = vpop.f32.mrf.mxu3 }
  0xd0   :  { %v336_v46 = vadd.f32 %v335_v4, %v307_v39 }
  0xd2   :  { %v251_v5 = vpop.f32.mrf.mxu0  ;;  %v347_v53 = vmax.f32 %v1469_v36, %v336_v46 }
  0xd3   :  { %v252_v40 = vadd.f32 %v1442_v20, %v251_v5 }
  0xd5   :  { %v280_v6 = vpop.f32.mrf.mxu1 }
  0xd6   :  { %v309_v7 = vpop.f32.mrf.mxu2  ;;  %v281_v47 = vadd.f32 %v280_v6, %v252_v40 }
  0xd8   :  { %v310_v54 = vadd.f32 %v309_v7, %v281_v47 }
  0xd9   :  { %v338_v8 = vpop.f32.mrf.mxu3 }
  0xda   :  { %v339_v3 = vadd.f32 %v338_v8, %v310_v54 }
  0xdc   :  { %v254_v9 = vpop.f32.mrf.mxu0 }
  0xdd   :  { %v255_v56 = vadd.f32 %v1442_v20, %v254_v9 }
  0xdf   :  { %v283_v10 = vpop.f32.mrf.mxu1 }
  0xe0   :  { %v312_v11 = vpop.f32.mrf.mxu2  ;;  %v284_v4 = vadd.f32 %v283_v10, %v255_v56 }
  0xe3   :  { %v1492_v12 = vpop.f32.mrf.mxu3 }
  0xe6   :  { %v257_v13 = vpop.f32.mrf.mxu0 }
  0xe9   :  { %v1494_v14 = vpop.f32.mrf.mxu1 }
  0xea   :  { %v1496_v15 = vpop.f32.mrf.mxu2 }
  0xed   :  { %v1498_v16 = vpop.f32.mrf.mxu3 }
  0xf0   :  { %v385_v17 = vpop.f32.mrf.mxu0 }
  0xf1   :  { %v386_v32 = vadd.f32 %v1442_v20, %v385_v17 }
  0xf3   :  { %v414_v18 = vpop.f32.mrf.mxu1 }
  0xf4   :  { %v415_v37 = vadd.f32 %v414_v18, %v386_v32  ;;  %v348_v18 = vmax.f32 %v1484_v48, %v339_v3 }
  0xf5   :  { %v443_v19 = vpop.f32.mrf.mxu2 }
  0xf6   :  { %v444_v41 = vadd.f32 %v443_v19, %v415_v37  ;;  %v313_v19 = vadd.f32 %v312_v11, %v284_v4 }
  0xf7   :  { %v472_v21 = vpop.f32.mrf.mxu3 }
  0xf8   :  { %v473_v50 = vadd.f32 %v472_v21, %v444_v41  ;;  %v258_v21 = vadd.f32 %v1442_v20, %v257_v13  ;;  %v342_v48 = vadd.f32 %v1492_v12, %v313_v19 }
  0xfa   :  { %v388_v22 = vpop.f32.mrf.mxu0  ;;  %v484_v55 = vmax.f32 %v347_v53, %v473_v50  ;;  %v287_v11 = vadd.f32 %v1494_v14, %v258_v21  ;;  %v349_v41 = vmax.f32 %v1487_v59, %v342_v48 }
  0xfb   :  { %v389_v42 = vadd.f32 %v1442_v20, %v388_v22 }
  0xfd   :  { %v417_v23 = vpop.f32.mrf.mxu1 }
  0xfe   :  { %v446_v24 = vpop.f32.mrf.mxu2  ;;  %v418_v51 = vadd.f32 %v417_v23, %v389_v42 }
 0x100   :  { %v447_v61 = vadd.f32 %v446_v24, %v418_v51 }
 0x101   :  { %v475_v25 = vpop.f32.mrf.mxu3 }
 0x102   :  { %v476_v36 = vadd.f32 %v475_v25, %v447_v61 }
 0x104   :  { %v391_v26 = vpop.f32.mrf.mxu0  ;;  %v485_v10 = vmax.f32 %v348_v18, %v476_v36 }
 0x105   :  { %v392_v58 = vadd.f32 %v1442_v20, %v391_v26 }
 0x107   :  { %v420_v27 = vpop.f32.mrf.mxu1 }
 0x108   :  { %v449_v28 = vpop.f32.mrf.mxu2  ;;  %v421_v7 = vadd.f32 %v420_v27, %v392_v58 }
 0x10a   :  { %v450_v23 = vadd.f32 %v449_v28, %v421_v7  ;;  %v316_v28 = vadd.f32 %v1496_v15, %v287_v11 }
 0x10b   :  { %v478_v29 = vpop.f32.mrf.mxu3 }
 0x10c   :  { %v479_v34 = vadd.f32 %v478_v29, %v450_v23 }
 0x10e   :  { %v394_v31 = vpop.f32.mrf.mxu0  ;;  %v486_v12 = vmax.f32 %v349_v41, %v479_v34 }
 0x10f   :  { %v395_v24 = vadd.f32 %v1442_v20, %v394_v31 }
 0x111   :  { %v423_v33 = vpop.f32.mrf.mxu1 }
 0x112   :  { %v1502_v35 = vpop.f32.mrf.mxu2  ;;  %v424_v37 = vadd.f32 %v423_v33, %v395_v24 }
 0x114   :  { %v453_v14 = vadd.f32 %v1502_v35, %v424_v37 }
 0x115   :  { %v1504_v38 = vpop.f32.mrf.mxu3 }
 0x116   :  { %v482_v15 = vadd.f32 %v1504_v38, %v453_v14 }
 0x118   :  { %v522_v43 = vpop.f32.mrf.mxu0 }
 0x119   :  { %v523_v44 = vadd.f32 %v1442_v20, %v522_v43  ;;  %v551_v45 = vpop.f32.mrf.mxu1 }
 0x11b   :  { %v552_v49 = vadd.f32 %v551_v45, %v523_v44  ;;  %v345_v45 = vadd.f32 %v1498_v16, %v316_v28 }
 0x11d   :  { %v580_v52 = vpop.f32.mrf.mxu2  ;;  %v350_v50 = vmax.f32 %v1490_v0, %v345_v45 }
 0x11e   :  { %v581_v60 = vadd.f32 %v580_v52, %v552_v49 }
 0x11f   :  { %v609_v63 = vpop.f32.mrf.mxu3  ;;  %v487_v52 = vmax.f32 %v350_v50, %v482_v15 }
 0x120   :  { %v610_v57 = vadd.f32 %v609_v63, %v581_v60  ;;  %v525_v62 = vpop.f32.mrf.mxu0 }
 0x121   :  { %v526_v1 = vadd.f32 %v1442_v20, %v525_v62  ;;  %v554_v2 = vpop.f32.mrf.mxu1 }
 0x122   :  { %v621_v5 = vmax.f32 %v484_v55, %v610_v57 }
 0x123   :  { %v555_v6 = vadd.f32 %v554_v2, %v526_v1 }
 0x124   :  { %v625_v17 = vmax.f32 %v621_v5, 0.0 }
 0x125   :  { %v583_v9 = vpop.f32.mrf.mxu2 }
 0x126   :  { %630 = vst.msk [vmem:[%s1545_s3] sm:$0xff] %vm629_vm0, %v625_v17  ;;  %v584_v22 = vadd.f32 %v583_v9, %v555_v6 }
 0x127   :  { %v612_v8 = vpop.f32.mrf.mxu3 }
 0x128   :  { %v613_v25 = vadd.f32 %v612_v8, %v584_v22  ;;  %v528_v26 = vpop.f32.mrf.mxu0 }
 0x129   :  { %v529_v27 = vadd.f32 %v1442_v20, %v528_v26  ;;  %v557_v30 = vpop.f32.mrf.mxu1 }
 0x12a   :  { %v622_v13 = vmax.f32 %v485_v10, %v613_v25 }
 0x12b   :  { %v558_v32 = vadd.f32 %v557_v30, %v529_v27 }
 0x12c   :  { %v626_v39 = vmax.f32 %v622_v13, 0.0 }
 0x12d   :  { %v586_v40 = vpop.f32.mrf.mxu2 }
 0x12e   :  { %631 = vst.msk [vmem:[%s1545_s3 + $0x8] sm:$0xff] %vm629_vm0, %v626_v39  ;;  %v587_v31 = vadd.f32 %v586_v40, %v558_v32 }
 0x12f   :  { %v615_v42 = vpop.f32.mrf.mxu3 }
 0x130   :  { %v616_v43 = vadd.f32 %v615_v42, %v587_v31  ;;  %v531_v44 = vpop.f32.mrf.mxu0 }
 0x131   :  { %v532_v29 = vadd.f32 %v1442_v20, %v531_v44  ;;  %v560_v33 = vpop.f32.mrf.mxu1 }
 0x132   :  { %v623_v59 = vmax.f32 %v486_v12, %v616_v43 }
 0x133   :  { %v561_v46 = vadd.f32 %v560_v33, %v532_v29 }
 0x134   :  { %v627_v47 = vmax.f32 %v623_v59, 0.0 }
 0x135   :  { %v589_v49 = vpop.f32.mrf.mxu2 }
 0x136   :  { %632 = vst.msk [vmem:[%s1545_s3 + $0x10] sm:$0xff] %vm629_vm0, %v627_v47  ;;  %v590_v35 = vadd.f32 %v589_v49, %v561_v46 }
 0x137   :  { %v618_v51 = vpop.f32.mrf.mxu3 }
 0x138   :  { %v619_v20 = vadd.f32 %v618_v51, %v590_v35 }
 0x13a   :  { %v624_v53 = vmax.f32 %v487_v52, %v619_v20 }
 0x13c   :  { %v628_v54 = vmax.f32 %v624_v53, 0.0 }
 0x13e   :  { %633 = vst.msk [vmem:[%s1545_s3 + $0x18] sm:$0xff] %vm629_vm0, %v628_v54 }

// kernel: forward.5
= control target key start
LH: loop header
LB: loop body
LE: loop exit
PB: predicated region body
PF: predicated region fallthrough
CT: control target
= control target key end

     0   :  { %vm157_vm0 = vcmask 64512   ;;  %s794_s0 = inlined_call_operand.vmem [shape: f32[2,288], index: 0, kind: input, shape index: {}]   ;;  %s795_s1 = inlined_call_operand.vmem [shape: f32[2,8], index: 1, kind: input, shape index: {}]   ;;  %s796_s2 = inlined_call_operand.vmem [shape: f32[288,32], index: 2, kind: input, shape index: {}]   ;;  %s797_s3 = inlined_call_operand.vmem [shape: f32[1,32], index: 3, kind: input, shape index: {}]   ;;  %s798_s4 = inlined_call_operand.vmem [shape: f32[8,12], index: 4, kind: input, shape index: {}]   ;;  %s799_s5 = inlined_call_operand.vmem [shape: f32[1,12], index: 5, kind: input, shape index: {}]   ;;  %s800_s6 = inlined_call_operand.vmem [shape: f32[32,256], index: 6, kind: input, shape index: {}]   ;;  %s801_s7 = inlined_call_operand.vmem [shape: f32[12,256], index: 7, kind: input, shape index: {}]   ;;  %s802_s8 = inlined_call_operand.vmem [shape: f32[1,256], index: 8, kind: input, shape index: {}]   ;;  %s803_s9 = inlined_call_operand.vmem [shape: f32[256,7], index: 9, kind: input, shape index: {}]   ;;  %s804_s10 = inlined_call_operand.vmem [shape: f32[1,7], index: 10, kind: input, shape index: {}]   ;;  %s805_s11 = inlined_call_operand.hbm [shape: f32[2,6], index: 11, kind: output, shape index: {}]  }
   0x1   :  { %v55_v0 = vld [vmem:[%s796_s2 + $0x78] sm:$0xff]  ;;  %v54_v1 = vld [vmem:[%s796_s2 + $0x70] sm:$0xff]  ;;  %v53_v4 = vld [vmem:[%s796_s2 + $0x68] sm:$0xff] }
   0x2   :  { %v71_v2 = vld [vmem:[%s796_s2 + $0xf8] sm:$0xff]  ;;  %90 = vmatpush.msra.mxu0 %v55_v0  ;;  %v70_v3 = vld [vmem:[%s796_s2 + $0xf0] sm:$0xff]  ;;  %v69_v5 = vld [vmem:[%s796_s2 + $0xe8] sm:$0xff] }
   0x3   :  { %110 = vmatpush.msra.mxu1 %v71_v2  ;;  %v52_v6 = vld [vmem:[%s796_s2 + $0x60] sm:$0xff]  ;;  %v51_v8 = vld [vmem:[%s796_s2 + $0x58] sm:$0xff]  ;;  %v50_v10 = vld [vmem:[%s796_s2 + $0x50] sm:$0xff] }
   0x4   :  { %91 = vmatpush.msra.mxu0 %v54_v1  ;;  %v68_v7 = vld [vmem:[%s796_s2 + $0xe0] sm:$0xff]  ;;  %v67_v9 = vld [vmem:[%s796_s2 + $0xd8] sm:$0xff]  ;;  %v66_v11 = vld [vmem:[%s796_s2 + $0xd0] sm:$0xff] }
   0x5   :  { %111 = vmatpush.msra.mxu1 %v70_v3  ;;  %v152_v12 = vld [vmem:[%s798_s4] sm:$0xff]  ;;  %v49_v14 = vld [vmem:[%s796_s2 + $0x48] sm:$0xff]  ;;  %v47_v19 = vld [vmem:[%s796_s2 + $0x38] sm:$0xff] }
   0x6   :  { %92 = vmatpush.msra.mxu0 %v53_v4  ;;  %v151_v13 = vld [vmem:[%s795_s1] sm:$0x3]  ;;  %v65_v15 = vld [vmem:[%s796_s2 + $0xc8] sm:$0xff]  ;;  %176 = vmatpush.msra.mxu3 %v152_v12  ;;  %v63_v20 = vld [vmem:[%s796_s2 + $0xb8] sm:$0xff] }
   0x7   :  { %112 = vmatpush.msra.mxu1 %v69_v5  ;;  %v39_v16 = vld [vmem:[%s794_s0] sm:$0x3f]  ;;  %419 = vmatmul.msk.f32.vlgmr.msra.gmra.mxu3 %vm157_vm0, %v151_v13 }
   0x8   :  { %93 = vmatpush.msra.mxu0 %v52_v6  ;;  %v48_v17 = vld [vmem:[%s796_s2 + $0x40] sm:$0xff]  ;;  %81 = vst [vmem:[#allocation1] ss:$4 sm:$0xff] %v39_v16 }
   0x9   :  { %113 = vmatpush.msra.mxu1 %v68_v7  ;;  %v64_v18 = vld [vmem:[%s796_s2 + $0xc0] sm:$0xff] }
   0xa   :  { %94 = vmatpush.msra.mxu0 %v51_v8 }
   0xb   :  { %114 = vmatpush.msra.mxu1 %v67_v9 }
   0xc   :  { %95 = vmatpush.msra.mxu0 %v50_v10 }
   0xd   :  { %115 = vmatpush.msra.mxu1 %v66_v11 }
   0xe   :  { %96 = vmatpush.msra.mxu0 %v49_v14 }
   0xf   :  { %116 = vmatpush.msra.mxu1 %v65_v15 }
  0x10   :  { %16 = vsyncpa [#allocation3], 0  ;;  %97 = vmatpush.msra.mxu0 %v48_v17  ;;  %v46_v21 = vld [vmem:[%s796_s2 + $0x30] sm:$0xff]  ;;  %v45_v23 = vld [vmem:[%s796_s2 + $0x28] sm:$0xff]  ;;  %vm87_vm1 = vcmask 261120   ;;  %vm198_vm2 = vcmask 1043456  }
  0x11   :  { %117 = vmatpush.msra.mxu1 %v64_v18  ;;  %v62_v22 = vld [vmem:[%s796_s2 + $0xb0] sm:$0xff]  ;;  %v61_v24 = vld [vmem:[%s796_s2 + $0xa8] sm:$0xff]  ;;  %v44_v25 = vld [vmem:[%s796_s2 + $0x20] sm:$0xff]  ;;  %vm194_vm3 = vcmask 97280   ;;  %vm378_vm4 = vcmask 41984   ;;  %s464_s25 = smov [#allocation2]  }
  0x12   :  { %98 = vmatpush.msra.mxu0 %v47_v19  ;;  %v60_v26 = vld [vmem:[%s796_s2 + $0xa0] sm:$0xff]  ;;  %v43_v27 = vld [vmem:[%s796_s2 + $0x18] sm:$0xff]  ;;  %v42_v29 = vld [vmem:[%s796_s2 + $0x10] sm:$0xff]  ;;  %s407_s26 = sshll.u32 %s464_s25, 4  ;;  %s409_s28 = sshll.u32 %s805_s11, 4  ;;  %s408_s26 = int_to_ptr.vmem [resolvable:$true] %s407_s26  ;;  %s410_s28 = int_to_ptr.hbm [resolvable:$true] %s409_s28 }
  0x13   :  { %118 = vmatpush.msra.mxu1 %v63_v20  ;;  %v59_v28 = vld [vmem:[%s796_s2 + $0x98] sm:$0xff]  ;;  %v58_v30 = vld [vmem:[%s796_s2 + $0x90] sm:$0xff]  ;;  %v41_v31 = vld [vmem:[%s796_s2 + $0x8] sm:$0xff] }
  0x14   :  { %99 = vmatpush.msra.mxu0 %v46_v21  ;;  %v57_v32 = vld [vmem:[%s796_s2 + $0x88] sm:$0xff]  ;;  %v40_v33 = vld [vmem:[%s796_s2] sm:$0xff]  ;;  %v75_v37 = vld [vmem:[%s796_s2 + $0x118] sm:$0xff] }
  0x15   :  { %119 = vmatpush.msra.mxu1 %v62_v22  ;;  %v56_v34 = vld [vmem:[%s796_s2 + $0x80] sm:$0xff]  ;;  %v83_v36 = vld.sshfl [vmem:[#allocation1 + $0x8] sm:$0xff pattern:$0x73625140]  ;;  %v74_v38 = vld [vmem:[%s796_s2 + $0x110] sm:$0xff] }
  0x16   :  { %100 = vmatpush.msra.mxu0 %v45_v23  ;;  %v82_v35 = vld.sshfl [vmem:[#allocation1] sm:$0xff pattern:$0x73625140]  ;;  %v73_v39 = vld [vmem:[%s796_s2 + $0x108] sm:$0xff]  ;;  %v193_v42 = vld [vmem:[%s801_s7 + $0x18] sm:$0xf] }
  0x17   :  { %120 = vmatpush.msra.mxu1 %v61_v24  ;;  %v72_v40 = vld [vmem:[%s796_s2 + $0x100] sm:$0xff]  ;;  %v84_v41 = vld.sshfl [vmem:[#allocation1 + $0x10] sm:$0xff pattern:$0x73625140]  ;;  %422 = vmatpush.msk.msra.mxu2 %vm198_vm2, %v193_v42  ;;  %v191_v44 = vld [vmem:[%s801_s7 + $0x8] sm:$0xff] }
  0x18   :  { %101 = vmatpush.msra.mxu0 %v44_v25  ;;  %v192_v43 = vld [vmem:[%s801_s7 + $0x10] sm:$0xf]  ;;  %v190_v46 = vld [vmem:[%s801_s7] sm:$0xff]  ;;  %v189_v47 = vld [vmem:[%s800_s6 + $0x38] sm:$0xff] }
  0x19   :  { %121 = vmatpush.msra.mxu1 %v60_v26  ;;  %v188_v45 = vld [vmem:[%s800_s6 + $0x30] sm:$0xff]  ;;  %240 = vmatpush.msra.mxu2 %v191_v44  ;;  %v186_v48 = vld [vmem:[%s800_s6 + $0x20] sm:$0xff]  ;;  %v187_v49 = vld [vmem:[%s800_s6 + $0x28] sm:$0xff] }
  0x1a   :  { %102 = vmatpush.msra.mxu0 %v43_v27  ;;  %260 = vmatpush.msrb.mxu3 %v188_v45  ;;  %v184_v50 = vld [vmem:[%s800_s6 + $0x10] sm:$0xff]  ;;  %v185_v51 = vld [vmem:[%s800_s6 + $0x18] sm:$0xff]  ;;  %v182_v52 = vld [vmem:[%s800_s6] sm:$0xff] }
  0x1b   :  { %122 = vmatpush.msra.mxu1 %v59_v28  ;;  %280 = vmatpush.msrb.mxu2 %v189_v47  ;;  %v183_v53 = vld [vmem:[%s800_s6 + $0x8] sm:$0xff]  ;;  %v313_v54 = vld [vmem:[%s803_s9 + $0x78] sm:$0xff]  ;;  %v312_v55 = vld [vmem:[%s803_s9 + $0x70] sm:$0xff]  ;;  %v462_v47 = vmov 0  }
  0x1c   :  { %103 = vmatpush.msra.mxu0 %v42_v29  ;;  %261 = vmatpush.msrb.mxu3 %v186_v48  ;;  %v434_v56 = vld [vmem:[%s799_s5] ss:$0 sm:$0xff]  ;;  %v311_v57 = vld [vmem:[%s803_s9 + $0x68] sm:$0xff]  ;;  %v309_v61 = vld [vmem:[%s803_s9 + $0x58] sm:$0xff] }
  0x1d   :  { %123 = vmatpush.msra.mxu1 %v58_v30  ;;  %281 = vmatpush.msrb.mxu2 %v187_v49  ;;  %v310_v58 = vld [vmem:[%s803_s9 + $0x60] sm:$0xff]  ;;  %v329_v63 = vld [vmem:[%s803_s9 + $0xf8] sm:$0xff]  ;;  %v308_v0 = vld [vmem:[%s803_s9 + $0x50] sm:$0xff] }
  0x1e   :  { %104 = vmatpush.msra.mxu0 %v41_v31  ;;  %262 = vmatpush.msrb.mxu3 %v184_v50  ;;  %v328_v1 = vld [vmem:[%s803_s9 + $0xf0] sm:$0xff]  ;;  %v327_v2 = vld [vmem:[%s803_s9 + $0xe8] sm:$0xff]  ;;  %v326_v3 = vld [vmem:[%s803_s9 + $0xe0] sm:$0xff] }
  0x1f   :  { %124 = vmatpush.msra.mxu1 %v57_v32  ;;  %282 = vmatpush.msrb.mxu2 %v185_v51  ;;  %v325_v4 = vld [vmem:[%s803_s9 + $0xd8] sm:$0xff]  ;;  %v433_v5 = vld [vmem:[%s797_s3] ss:$0 sm:$0xff]  ;;  %v324_v6 = vld [vmem:[%s803_s9 + $0xd0] sm:$0xff] }
  0x20   :  { %105 = vmatpush.msra.mxu0 %v40_v33  ;;  %263 = vmatpush.msrb.mxu3 %v182_v52  ;;  %v307_v14 = vld [vmem:[%s803_s9 + $0x48] sm:$0xff]  ;;  %v306_v16 = vld [vmem:[%s803_s9 + $0x40] sm:$0xff]  ;;  %v305_v18 = vld [vmem:[%s803_s9 + $0x38] sm:$0xff] }
  0x21   :  { %125 = vmatpush.msra.mxu1 %v56_v34  ;;  %106 = vmatmul.f32.vlgmr.msra.gmra.mxu0 %v82_v35  ;;  %v323_v15 = vld [vmem:[%s803_s9 + $0xc8] sm:$0xff]  ;;  %v322_v17 = vld [vmem:[%s803_s9 + $0xc0] sm:$0xff]  ;;  %v321_v19 = vld [vmem:[%s803_s9 + $0xb8] sm:$0xff] }
  0x22   :  { %126 = vmatmul.f32.vlgmr.msra.gmra.mxu1 %v83_v36  ;;  %142 = vmatpush.msrb.mxu0 %v75_v37  ;;  %v304_v20 = vld [vmem:[%s803_s9 + $0x30] sm:$0xff]  ;;  %v303_v22 = vld [vmem:[%s803_s9 + $0x28] sm:$0xff]  ;;  %v302_v24 = vld [vmem:[%s803_s9 + $0x20] sm:$0xff] }
  0x23   :  { %420 = vmatpush.msk.msrb.mxu1 %vm198_vm2, %v192_v43  ;;  %283 = vmatpush.msrb.mxu2 %v183_v53  ;;  %v320_v21 = vld [vmem:[%s803_s9 + $0xb0] sm:$0xff]  ;;  %v319_v23 = vld [vmem:[%s803_s9 + $0xa8] sm:$0xff]  ;;  %v318_v25 = vld [vmem:[%s803_s9 + $0xa0] sm:$0xff] }
  0x24   :  { %143 = vmatpush.msrb.mxu0 %v74_v38  ;;  %334 = vmatpush.msra.mxu3 %v313_v54  ;;  %v301_v26 = vld [vmem:[%s803_s9 + $0x18] sm:$0xff]  ;;  %v300_v28 = vld [vmem:[%s803_s9 + $0x10] sm:$0xff]  ;;  %v299_v30 = vld [vmem:[%s803_s9 + $0x8] sm:$0xff] }
  0x25   :  { %220 = vmatpush.msrb.mxu1 %v190_v46  ;;  %v317_v27 = vld [vmem:[%s803_s9 + $0x98] sm:$0xff]  ;;  %v316_v29 = vld [vmem:[%s803_s9 + $0x90] sm:$0xff]  ;;  %v315_v31 = vld [vmem:[%s803_s9 + $0x88] sm:$0xff]  ;;  %431 = vset.pattern.permute.xlu1 %v462_v47 }
  0x26   :  { %144 = vmatpush.msrb.mxu0 %v73_v39  ;;  %335 = vmatpush.msra.mxu3 %v312_v55  ;;  %v298_v32 = vld [vmem:[%s803_s9] sm:$0xff] }
  0x27   :  { %v314_v33 = vld [vmem:[%s803_s9 + $0x80] sm:$0xff]  ;;  %432 = vset.pattern.permute.xlu0 %v462_v47 }
  0x28   :  { %145 = vmatpush.msrb.mxu0 %v72_v40  ;;  %336 = vmatpush.msra.mxu3 %v311_v57  ;;  %v288_v35 = vld [vmem:[%s802_s8] sm:$0x3]  ;;  %s463_s8 = smov 127  }
  0x29   :  { %418 = vmatmul.msk.f32.vlgmr.msrb.gmra.mxu0 %vm87_vm1, %v84_v41  ;;  %v290_v37 = vperm.slane %v288_v35, 0  ;;  %v291_v38 = vperm.slane %v288_v35, 1  ;;  %v435_v48 = vld [vmem:[%s804_s10] ss:$0 sm:$0xff] }
  0x2a   :  { %337 = vmatpush.msra.mxu3 %v310_v58 }
  0x2c   :  { %338 = vmatpush.msra.mxu3 %v309_v61 }
  0x2e   :  { %339 = vmatpush.msra.mxu3 %v308_v0 }
  0x30   :  { %340 = vmatpush.msra.mxu3 %v307_v14 }
  0x32   :  { %341 = vmatpush.msra.mxu3 %v306_v16 }
  0x34   :  { %342 = vmatpush.msra.mxu3 %v305_v18 }
  0x36   :  { %343 = vmatpush.msra.mxu3 %v304_v20 }
  0x38   :  { %344 = vmatpush.msra.mxu3 %v303_v22 }
  0x3a   :  { %345 = vmatpush.msra.mxu3 %v302_v24 }
  0x3c   :  { %346 = vmatpush.msra.mxu3 %v301_v26 }
  0x3e   :  { %347 = vmatpush.msra.mxu3 %v300_v28 }
  0x40   :  { %348 = vmatpush.msra.mxu3 %v299_v30 }
  0x42   :  { %349 = vmatpush.msra.mxu3 %v298_v32 }
  0x8a   :  { %v178_v59 = vpop.f32.mrf.mxu3 }
  0x8b   :  { %v179_v60 = vadd.f32 %v434_v56, %v178_v59 }
  0x8d   :  { %v181_v62 = vmax.f32 %v179_v60, 0.0 }
  0x8f   :  { %423 = vmatmul.msk.f32.vlgmr.msra.gmra.mxu2 %vm194_vm3, %v181_v62  ;;  %421 = vmatmul.msk.f32.vlgmr.msrb.gmra.mxu1 %vm194_vm3, %v181_v62 }
  0x90   :  { %354 = vmatpush.msra.mxu2 %v329_v63 }
  0x92   :  { %355 = vmatpush.msra.mxu2 %v328_v1 }
  0x94   :  { %356 = vmatpush.msra.mxu2 %v327_v2 }
  0x96   :  { %357 = vmatpush.msra.mxu2 %v326_v3 }
  0x98   :  { %358 = vmatpush.msra.mxu2 %v325_v4 }
  0x9a   :  { %359 = vmatpush.msra.mxu2 %v324_v6 }
  0x9c   :  { %360 = vmatpush.msra.mxu2 %v323_v15 }
  0x9e   :  { %v107_v7 = vpop.f32.mrf.mxu0  ;;  %361 = vmatpush.msra.mxu2 %v322_v17 }
  0x9f   :  { %v108_v8 = vadd.f32 %v433_v5, %v107_v7  ;;  %v127_v9 = vpop.f32.mrf.mxu1 }
  0xa0   :  { %362 = vmatpush.msra.mxu2 %v321_v19 }
  0xa1   :  { %v128_v10 = vadd.f32 %v127_v9, %v108_v8 }
  0xa2   :  { %363 = vmatpush.msra.mxu2 %v320_v21 }
  0xa4   :  { %364 = vmatpush.msra.mxu2 %v319_v23 }
  0xa6   :  { %v147_v11 = vpop.f32.mrf.mxu0  ;;  %365 = vmatpush.msra.mxu2 %v318_v25 }
  0xa7   :  { %v148_v12 = vadd.f32 %v147_v11, %v128_v10 }
  0xa8   :  { %366 = vmatpush.msra.mxu2 %v317_v27 }
  0xa9   :  { %v150_v13 = vmax.f32 %v148_v12, 0.0 }
  0xaa   :  { %367 = vmatpush.msra.mxu2 %v316_v29 }
  0xab   :  { %424 = vmatmul.msk.f32.vlgmr.msrb.gmra.mxu3 %vm87_vm1, %v150_v13  ;;  %425 = vmatmul.msk.f32.vlgmr.msrb.gmra.mxu2 %vm87_vm1, %v150_v13 }
  0xac   :  { %368 = vmatpush.msra.mxu2 %v315_v31 }
  0xae   :  { %369 = vmatpush.msra.mxu2 %v314_v33 }
 0x10c   :  { %v222_v36 = vpop.f32.mrf.mxu1 }
 0x112   :  { %v242_v34 = vpop.f32.mrf.mxu2 }
 0x12e   :  { %v265_v39 = vpop.f32.mrf.mxu3  ;;  %v285_v40 = vpop.f32.mrf.mxu2 }
 0x12f   :  { %v266_v41 = vadd.f32 %v265_v39, %v222_v36  ;;  %v286_v42 = vadd.f32 %v285_v40, %v242_v34 }
 0x131   :  { %v294_v43 = vadd.f32 %v290_v37, %v266_v41  ;;  %v295_v44 = vadd.f32 %v291_v38, %v286_v42 }
 0x133   :  { %v296_v45 = vmax.f32 %v294_v43, 0.0  ;;  %v297_v46 = vmax.f32 %v295_v44, 0.0 }
 0x135   :  { %350 = vmatmul.f32.vlgmr.msra.gmra.mxu3 %v296_v45  ;;  %370 = vmatmul.f32.vlgmr.msra.gmra.mxu2 %v297_v46 }
 0x1b8   :  { %v351_v49 = vpop.f32.mrf.mxu3  ;;  %v371_v51 = vpop.f32.mrf.mxu2 }
 0x1b9   :  { %v352_v50 = vadd.f32 %v435_v48, %v351_v49 }
 0x1bb   :  { %v372_v52 = vadd.f32 %v371_v51, %v352_v50 }
 0x1bd   :  { %391 = vperm.xlu1 %431, %v372_v52   ;;  %375 = vrot.lane.b32.xlu0 %v372_v52, %s463_s8 }
 0x22f   :  { %v376_v53 = vpop.permute.xlu0 %375  ;;  %v392_v62 = vpop.permute.xlu1 %391 }
 0x230   :  { %v379_v54 = vsel %vm378_vm4, %v376_v53, 0.0  ;;  %v394_v63 = vadd.f32 %v392_v62, %v372_v52 }
 0x231   :  { %380 = vadd.xlane.f32.xlu0 %v379_v54 }
 0x2a4   :  { %v381_v55 = vpop.xlane.xlu0 %380 }
 0x2a5   :  { %v382_v56 = vrot.slane %v381_v55, 4 }
 0x2a7   :  { %v383_v57 = vadd.f32 %v382_v56, %v381_v55 }
 0x2a9   :  { %v384_v58 = vrot.slane %v383_v57, 2 }
 0x2ab   :  { %v385_v59 = vadd.f32 %v384_v58, %v383_v57 }
 0x2ad   :  { %v386_v60 = vrot.slane %v385_v59, 1 }
 0x2af   :  { %v387_v61 = vadd.f32 %v386_v60, %v385_v59 }
 0x2b1   :  { %426 = vpush %v387_v61 }
 0x2e2   :  { %s427_s10 = spop %426 }
 0x2e3   :  { %s389_s24 = smul.f32 0.083333336, %s427_s10 }
 0x2e5   :  { %v395_v0 = vstv %s389_s24 }
 0x2e6   :  { %v396_v1 = vsub.f32 %v394_v63, %v395_v0 }
 0x2e8   :  { %398 = vrot.lane.b32.xlu1 %v396_v1, %s463_s8 }
 0x35a   :  { %v399_v2 = vpop.permute.xlu1 %398 }
 0x35b   :  { %401 = vst.msk [vmem:[#allocation2] sm:$0x3] %vm378_vm4, %v399_v2 }
 0x35c   :  { %412 = dma.vmem_to_hbm [thread:$0]  %s408_s26, 32, %s410_s28, [#allocation3]  }
 0x35d   :  { %460 = dma.done.wait [#allocation3], 32  }
 0x35e   :  { %461 = vsyncadd [#allocation3], 4294967264 }
 0x35f   :  { %417 = vsyncpa [#allocation3], 1 }

</bundles_post_ra>
